<compile_context>
chip_gen: v7x
topology: tpu7x:2x2x1
jax: 0.10.0
libtpu: 0.0.40
codegen_flags: <defaults>
</compile_context>

<pallas_src>
import jax
import jax.numpy as jnp
from jax.experimental import pallas as pl
from jax.experimental.pallas import tpu as pltpu


def _my_loss_kernel(a_ref, p_ref, t_ref, out_ref):
    eps = jnp.float32(1e-6)  # nn.PairwiseDistance default eps (added to the diff)
    a = a_ref[...].astype(jnp.float32)
    p = p_ref[...].astype(jnp.float32)
    t = t_ref[...].astype(jnp.float32)

    diff_ap = a - p + eps
    diff_at = a - t + eps

    # per-row L2 norms (reduce over lane axis), keepdims -> (TILE_N, 1)
    disa = jnp.sqrt(jnp.sum(diff_ap * diff_ap, axis=-1, keepdims=True))
    dist = jnp.sqrt(jnp.sum(diff_at * diff_at, axis=-1, keepdims=True))

    minus = jnp.abs(dist - disa)
    pred = jnp.where(minus <= 1.0, jnp.float32(1.0), jnp.float32(-1.0))
    # per-row hinge; the mean over the true N rows is finished in the wrapper
    hinge = jnp.maximum(disa - dist + 1.0, 0.0)

    out_ref[:, 0:1] = disa
    out_ref[:, 1:2] = dist
    out_ref[:, 2:3] = minus
    out_ref[:, 3:4] = pred
    out_ref[:, 4:5] = hinge


def _default_tile_n(n, d, itemsize):
    # Target ~1 MiB per input tile (comfortable double-buffered even on v7x's
    # 64 MiB VMEM / 32 MiB scoped default); multiple of 8 for f32 sublanes.
    target_bytes = 1 << 20
    t = target_bytes // max(1, d * itemsize)
    t = max(8, min(4096, (t // 8) * 8))
    return n if t >= n else t


def _my_loss_pallas(anchor, pos, test, tile_n):
    n, d = anchor.shape
    grid_n = pl.cdiv(n, tile_n)
    itemsize = jnp.dtype(anchor.dtype).itemsize

    out = pl.pallas_call(
        _my_loss_kernel,
        out_shape=jax.ShapeDtypeStruct((n, 5), jnp.float32),
        grid_spec=pltpu.PrefetchScalarGridSpec(
            num_scalar_prefetch=0,
            grid=(grid_n,),
            in_specs=[
                pl.BlockSpec((tile_n, d), lambda i: (i, 0)),
                pl.BlockSpec((tile_n, d), lambda i: (i, 0)),
                pl.BlockSpec((tile_n, d), lambda i: (i, 0)),
            ],
            out_specs=pl.BlockSpec((tile_n, 5), lambda i: (i, 0)),
        ),
        compiler_params=pltpu.CompilerParams(
            dimension_semantics=("parallel",),  # shard row-tiles across TCs (v7x)
        ),
        cost_estimate=pl.CostEstimate(
            flops=int(6 * n * d),
            transcendentals=int(2 * n),
            bytes_accessed=int(3 * n * d * itemsize + 5 * n * 4),
        ),
    )(anchor, pos, test)
    return out


def my_loss(anchor, pos, test, y, *, tile_n=None, use_pallas=None):
    """Pallas implementation of My_loss.forward.

    anchor/pos/test: (N, D). y: passed through untouched.
    Returns (res, pred, disa, dist, minus, y) matching the PyTorch module.
    """
    anchor = jnp.asarray(anchor)
    pos = jnp.asarray(pos)
    test = jnp.asarray(test)
    n, d = anchor.shape

    if use_pallas is None:
        # Pallas launch overhead dominates tiny problems; let XLA fuse those.
        use_pallas = (n * d) >= 4096

    if not use_pallas:
        eps = jnp.float32(1e-6)
        a = anchor.astype(jnp.float32)
        disa = jnp.sqrt(jnp.sum(jnp.square(a - pos.astype(jnp.float32) + eps), axis=-1))
        dist = jnp.sqrt(jnp.sum(jnp.square(a - test.astype(jnp.float32) + eps), axis=-1))
        minus = jnp.abs(dist - disa)
        pred = jnp.where(minus <= 1.0, 1.0, -1.0).astype(jnp.float32)
        res = jnp.mean(jnp.maximum(disa - dist + 1.0, 0.0))
        return res, pred, disa, dist, minus, y

    if tile_n is None:
        tile_n = _default_tile_n(n, d, jnp.dtype(anchor.dtype).itemsize)
    elif tile_n >= n:
        tile_n = n                       # single block == full array dims
    else:
        tile_n = max(8, (tile_n // 8) * 8)  # f32 sublane multiple

    out = _my_loss_pallas(anchor, pos, test, tile_n)
    disa = out[:, 0]
    dist = out[:, 1]
    minus = out[:, 2]
    pred = out[:, 3]
    res = jnp.sum(out[:, 4]) / jnp.float32(n)  # finish mean over true N rows
    return res, pred, disa, dist, minus, y


if __name__ == "__main__":
    key = jax.random.PRNGKey(0)
    k1, k2, k3, k4 = jax.random.split(key, 4)

    def reference(anchor, pos, test):
        eps = 1e-6
        disa = jnp.linalg.norm(anchor - pos + eps, axis=-1)
        dist = jnp.linalg.norm(anchor - test + eps, axis=-1)
        minus = jnp.abs(dist - disa)
        pred = jnp.where(minus <= 1.0, 1.0, -1.0)
        res = jnp.mean(jnp.maximum(disa - dist + 1.0, 0.0))
        return res, pred, disa, dist, minus

    # --- Pallas path: multi-tile grid with a ragged last tile -------------
    N, D = 300, 128
    anchor = jax.random.normal(k1, (N, D), dtype=jnp.float32)
    pos = jax.random.normal(k2, (N, D), dtype=jnp.float32)
    test = jax.random.normal(k3, (N, D), dtype=jnp.float32)
    y = jax.random.normal(k4, (N,), dtype=jnp.float32)

    res, pred, disa, dist, minus, y_out = my_loss(anchor, pos, test, y, tile_n=128)
    jax.block_until_ready((res, pred, disa, dist, minus, y_out))

    r_res, r_pred, r_disa, r_dist, r_minus = reference(anchor, pos, test)
    assert jnp.allclose(disa, r_disa, atol=1e-4, rtol=1e-5)
    assert jnp.allclose(dist, r_dist, atol=1e-4, rtol=1e-5)
    assert jnp.allclose(minus, r_minus, atol=1e-4, rtol=1e-5)
    assert jnp.allclose(pred, r_pred)
    assert jnp.allclose(res, r_res, atol=1e-5, rtol=1e-5)
    assert jnp.allclose(y_out, y)

    # --- Tiny-shape path (pure-JAX fallback; Pallas overhead not worth it) -
    Nt, Dt = 8, 32
    a2 = jax.random.normal(k1, (Nt, Dt), dtype=jnp.float32)
    p2 = jax.random.normal(k2, (Nt, Dt), dtype=jnp.float32)
    t2 = jax.random.normal(k3, (Nt, Dt), dtype=jnp.float32)
    y2 = jax.random.normal(k4, (Nt,), dtype=jnp.float32)
    res2, pred2, disa2, dist2, minus2, _ = my_loss(a2, p2, t2, y2)
    jax.block_until_ready(res2)
    r2 = reference(a2, p2, t2)
    assert jnp.allclose(res2, r2[0], atol=1e-5)
    assert jnp.allclose(disa2, r2[2], atol=1e-5)

    print("KERNEL_OK")
</pallas_src>

<mosaic_0001>
module attributes {stable_mosaic.version = 11 : i64} {
  func.func @_my_loss_kernel(%arg0: i32, %arg1: memref<128x128xf32, #tpu.memory_space<vmem>>, %arg2: memref<128x128xf32, #tpu.memory_space<vmem>>, %arg3: memref<128x128xf32, #tpu.memory_space<vmem>>, %arg4: memref<128x5xf32, #tpu.memory_space<vmem>>) attributes {dimension_semantics = [#tpu.dimension_semantics<parallel>], iteration_bounds = array<i64: 3>, scalar_prefetch = 0 : i64, scratch_operands = 0 : i64, tpu.core_type = #tpu.core_type<tc>, window_params = [{transform_indices = @transform_0, window_bounds = array<i64: 128, 128>}, {transform_indices = @transform_1, window_bounds = array<i64: 128, 128>}, {transform_indices = @transform_2, window_bounds = array<i64: 128, 128>}, {transform_indices = @transform_3, window_bounds = array<i64: 128, 5>}]} {
    %c0 = arith.constant 0 : index
    %c0_0 = arith.constant 0 : index
    %0 = vector.load %arg1[%c0, %c0_0] : memref<128x128xf32, #tpu.memory_space<vmem>>, vector<128x128xf32>
    %c0_1 = arith.constant 0 : index
    %c0_2 = arith.constant 0 : index
    %1 = vector.load %arg2[%c0_1, %c0_2] : memref<128x128xf32, #tpu.memory_space<vmem>>, vector<128x128xf32>
    %c0_3 = arith.constant 0 : index
    %c0_4 = arith.constant 0 : index
    %2 = vector.load %arg3[%c0_3, %c0_4] : memref<128x128xf32, #tpu.memory_space<vmem>>, vector<128x128xf32>
    %3 = arith.subf %0, %1 : vector<128x128xf32>
    %cst = arith.constant 9.99999997E-7 : f32
    %4 = vector.broadcast %cst : f32 to vector<128x128xf32>
    %5 = arith.addf %3, %4 : vector<128x128xf32>
    %6 = arith.subf %0, %2 : vector<128x128xf32>
    %cst_5 = arith.constant 9.99999997E-7 : f32
    %7 = vector.broadcast %cst_5 : f32 to vector<128x128xf32>
    %8 = arith.addf %6, %7 : vector<128x128xf32>
    %9 = arith.mulf %5, %5 : vector<128x128xf32>
    %cst_6 = arith.constant dense<0.000000e+00> : vector<128xf32>
    %10 = vector.multi_reduction <add>, %9, %cst_6 [1] : vector<128x128xf32> to vector<128xf32>
    %11 = vector.shape_cast %10 : vector<128xf32> to vector<128x1xf32>
    %12 = math.sqrt %11 : vector<128x1xf32>
    %13 = arith.mulf %8, %8 : vector<128x128xf32>
    %cst_7 = arith.constant dense<0.000000e+00> : vector<128xf32>
    %14 = vector.multi_reduction <add>, %13, %cst_7 [1] : vector<128x128xf32> to vector<128xf32>
    %15 = vector.shape_cast %14 : vector<128xf32> to vector<128x1xf32>
    %16 = math.sqrt %15 : vector<128x1xf32>
    %17 = arith.subf %16, %12 : vector<128x1xf32>
    %18 = math.absf %17 : vector<128x1xf32>
    %cst_8 = arith.constant 1.000000e+00 : f32
    %19 = vector.broadcast %cst_8 : f32 to vector<128x1xf32>
    %20 = arith.cmpf ole, %18, %19 : vector<128x1xf32>
    %cst_9 = arith.constant 1.000000e+00 : f32
    %cst_10 = arith.constant -1.000000e+00 : f32
    %21 = vector.broadcast %cst_9 : f32 to vector<128x1xf32>
    %22 = vector.broadcast %cst_10 : f32 to vector<128x1xf32>
    %23 = arith.select %20, %21, %22 : vector<128x1xi1>, vector<128x1xf32>
    %24 = arith.subf %12, %16 : vector<128x1xf32>
    %cst_11 = arith.constant 1.000000e+00 : f32
    %25 = vector.broadcast %cst_11 : f32 to vector<128x1xf32>
    %26 = arith.addf %24, %25 : vector<128x1xf32>
    %cst_12 = arith.constant 0.000000e+00 : f32
    %27 = vector.broadcast %cst_12 : f32 to vector<128x1xf32>
    %28 = arith.maximumf %26, %27 : vector<128x1xf32>
    %c0_13 = arith.constant 0 : index
    %c0_14 = arith.constant 0 : index
    %29 = vector.load %arg4[%c0_13, %c0_14] : memref<128x5xf32, #tpu.memory_space<vmem>>, vector<128x1xf32>
    tpu.vector_store %arg4[%c0_13, %c0_14], %12 {strides = array<i32>} : memref<128x5xf32, #tpu.memory_space<vmem>>, vector<128x1xf32>,
    %c0_15 = arith.constant 0 : index
    %c1 = arith.constant 1 : index
    %30 = vector.load %arg4[%c0_15, %c1] : memref<128x5xf32, #tpu.memory_space<vmem>>, vector<128x1xf32>
    tpu.vector_store %arg4[%c0_15, %c1], %16 {strides = array<i32>} : memref<128x5xf32, #tpu.memory_space<vmem>>, vector<128x1xf32>,
    %c0_16 = arith.constant 0 : index
    %c2 = arith.constant 2 : index
    %31 = vector.load %arg4[%c0_16, %c2] : memref<128x5xf32, #tpu.memory_space<vmem>>, vector<128x1xf32>
    tpu.vector_store %arg4[%c0_16, %c2], %18 {strides = array<i32>} : memref<128x5xf32, #tpu.memory_space<vmem>>, vector<128x1xf32>,
    %c0_17 = arith.constant 0 : index
    %c3 = arith.constant 3 : index
    %32 = vector.load %arg4[%c0_17, %c3] : memref<128x5xf32, #tpu.memory_space<vmem>>, vector<128x1xf32>
    tpu.vector_store %arg4[%c0_17, %c3], %23 {strides = array<i32>} : memref<128x5xf32, #tpu.memory_space<vmem>>, vector<128x1xf32>,
    %c0_18 = arith.constant 0 : index
    %c4 = arith.constant 4 : index
    %33 = vector.load %arg4[%c0_18, %c4] : memref<128x5xf32, #tpu.memory_space<vmem>>, vector<128x1xf32>
    tpu.vector_store %arg4[%c0_18, %c4], %28 {strides = array<i32>} : memref<128x5xf32, #tpu.memory_space<vmem>>, vector<128x1xf32>,
    return
  }
  func.func @transform_0(%arg0: i32) -> (i32, i32) {
    %c0_i32 = arith.constant 0 : i32
    %c0_i32_0 = arith.constant 0 : i32
    return %arg0, %c0_i32 : i32, i32
  }
  func.func @transform_1(%arg0: i32) -> (i32, i32) {
    %c0_i32 = arith.constant 0 : i32
    %c0_i32_0 = arith.constant 0 : i32
    return %arg0, %c0_i32 : i32, i32
  }
  func.func @transform_2(%arg0: i32) -> (i32, i32) {
    %c0_i32 = arith.constant 0 : i32
    %c0_i32_0 = arith.constant 0 : i32
    return %arg0, %c0_i32 : i32, i32
  }
  func.func @transform_3(%arg0: i32) -> (i32, i32) {
    %c0_i32 = arith.constant 0 : i32
    %c0_i32_0 = arith.constant 0 : i32
    return %arg0, %c0_i32 : i32, i32
  }
}

</mosaic_0001>

<bundles_post_ra>
// kernel: tpu_custom_call.1
= control target key start
LH: loop header
LB: loop body
LE: loop exit
PB: predicated region body
PF: predicated region fallthrough
CT: control target
= control target key end

     0   :  { %8 = vsyncpa [#allocation3], 0  ;;  %s2680_s0 = inlined_call_operand.hbm [shape: f32[300,128], index: 0, kind: input, shape index: {}]   ;;  %s2681_s1 = inlined_call_operand.hbm [shape: f32[300,128], index: 1, kind: input, shape index: {}]   ;;  %s2682_s2 = inlined_call_operand.hbm [shape: f32[300,128], index: 2, kind: input, shape index: {}]   ;;  %s2683_s3 = inlined_call_operand.vmem [shape: f32[300,5], index: 3, kind: output, shape index: {}]  }
   0x1   :  { %10 = vsyncpa [#allocation3 + $0x1], 0 }
   0x2   :  { %11 = vsyncpa [#allocation5], 0 }
   0x3   :  { %13 = vsyncpa [#allocation5 + $0x1], 0  ;;  %s1698_s12 = smov 0   ;;  %s1700_s13 = smov 0  }
   0x4   :  { %s1702_s14 = smov 0   ;;  %s1704_s15 = smov 0  }
   0x5 LB: > { %s1717_s16 = sadd.s32 4294967295, %s1634_s15   ;;  %s1720_s17 = sadd.s32 1, %s1634_s15   ;;  %s1634_s15 = sphi %s1704_s15, %s2694_s15   ;;  %s1630_s14 = sphi %s1702_s14, %s2693_s14   ;;  %s1626_s13 = sphi %s1700_s13, %s2692_s13   ;;  %s1622_s12 = sphi %s1698_s12, %s2691_s12  }
   0x6   : > { %s23_s18 = ssub.s32 %s1634_s15, %s1720_s17  ;;  %s26_s19 = sadd.s32 1, %s1630_s14 }
   0x7   : > { %p24_p0 = scmp.eq.s32.totalorder %s23_s18, 0  ;;  %p33_p1 = scmp.ne.s32.totalorder %s1630_s14, %s1626_s13 }
   0x8   : > { %p34_p2 = scmp.eq.s32.totalorder %s1634_s15, 0  ;;  %p39_p3 = scmp.ne.s32.totalorder %s1626_s13, %s1622_s12 }
   0x9   : > { %s1730_s20 = scalar_select %p24_p0, %s1630_s14, %s26_s19  }
   0xa   : > { %p1732_p4 = por %p34_p2, %p33_p1  ;;  %p40_p5 = scmp.eq.s32.totalorder %s1717_s16, 0 }
   0xb   : > { %p115_p6 = scmp.eq.s32.totalorder %s1717_s16, 2  ;;  %p1260_p9 = scmp.ge.s32.totalorder %s1634_s15, 3 }
   0xc   : > { %p1738_p7 = por %p40_p5, %p39_p3 }
   0xd   : > { %p1742_p8 = por %p115_p6, %p33_p1  ;;  %137 = sbr.rel (%p1260_p9) target bundleno = 125 (0x7d), region = 16 }
   0xf   : > { %s2686_s23 = scalar_select %p1742_p8, 1, 0 }
  0x14   : > { %140 = sbr.rel (!%p1732_p4) target bundleno = 55 (0x37), region = 20  ;;  %s141_s24 = sand.u32 (%p1732_p4), 1, %s1630_s14  }
  0x15   : > { %s1262_s25 = sshll.u32 (%p1732_p4), %s1634_s15, 4  ;;  %s1261_s26 = sshll.u32 (%p1732_p4), %s141_s24, 7 }
  0x16   : > { %s147_s27 = ssub.s32 (%p1732_p4), 38, %s1262_s25  ;;  %s1754_s30 = scalar_lea.sflag (%p1732_p4), [#allocation3], %s141_s24 }
  0x17   : > { %p148_p10 = scmp.lt.s32.totalorder (%p1732_p4), %s147_s27, 16  ;;  %s145_s4 = scalar_lea.vmem (%p1732_p4), [#allocation2], %s1261_s26 }
  0x1b   : > { %s2696_s27 = smov (!%p148_p10, %s147_s27), 16 }
  0x1c   : > { %s1751_s28 = sshll.u32 %s2696_s27, 7 }
  0x1d   : > { %s152_s29 = ssub.s32 2048, %s1751_s28 }
  0x1e   : > { %153 = vsyncadd %s1754_s30, %s152_s29  ;;  %p1264_p11 = scmp.ne.s32.totalorder %s1751_s28, 0  ;;  %s1304_s5 = sshll.u32 %s1634_s15, 11 }
  0x1f   : > { %s1762_s8 = scalar_lea.hbm %s2680_s0, %s1304_s5  ;;  %s158_s9 = sshll.u32 %s145_s4, 4  ;;  %s1764_s9 = int_to_ptr.vmem [resolvable:$true] %s158_s9 }
  0x20   : > { %s1480_s10 = scalar_lea.hbm %s1762_s8, %s1751_s28  ;;  %s1484_s18 = scalar_lea.hbm %s2680_s0, 4864 }
  0x21   : > { %p1481_p12 = scmp.ne.s32.totalorder %s1762_s8, %s1480_s10  ;;  %p1485_p1 = scmp.lt.u32.totalorder %s1762_s8, %s2680_s0 }
  0x22   : > { %p1486_p2 = scmp.lt.u32.totalorder %s1484_s18, %s1480_s10  ;;  %p1488_p5 = scmp.lt.u32.totalorder %s1480_s10, %s1762_s8 }
  0x23   : > { %p1482_p13 = pnand %p1481_p12, %p1264_p11 }
  0x24   : > { %p1487_p3 = por %p1486_p2, %p1485_p1 }
  0x25   : > { %p1483_p0 = pneg %p1482_p13 }
  0x26   : > { %p1489_p6 = por %p1488_p5, %p1487_p3 }
  0x28   : > { %p1490_p9 = pnand %p1489_p6, %p1483_p0 }
  0x2a   : > { %1493 = shalt.err (!%p1490_p9)
}
  0x2b   : > { %s1494_s25 = scalar_lea.vmem %s1764_s9, %s1751_s28  ;;  %s1668_s26 = smov [#allocation2]  }
  0x2c   : > { %p1495_p10 = scmp.ne.s32.totalorder %s1764_s9, %s1494_s25  ;;  %s1498_s27 = sshll.u32 %s1668_s26, 4  ;;  %s1499_s27 = int_to_ptr.vmem [resolvable:$false] %s1498_s27 }
  0x2d   : > { %s1500_s29 = scalar_lea.vmem %s1499_s27, 4096  ;;  %p1501_p8 = scmp.lt.s32.totalorder %s1764_s9, %s1499_s27 }
  0x2e   : > { %p1496_p12 = pnand %p1495_p10, %p1264_p11  ;;  %p1502_p1 = scmp.lt.s32.totalorder %s1500_s29, %s1494_s25 }
  0x30   : > { %p1497_p13 = pneg %p1496_p12  ;;  %p1503_p2 = por %p1502_p1, %p1501_p8 }
  0x32   : > { %p1504_p3 = pnand %p1503_p2, %p1497_p13 }
  0x34   : > { %1507 = shalt.err (!%p1504_p3)
}
  0x35   : > { %s1669_s4 = smov 128   ;;  %s1670_s5 = smov 8  }
  0x36   : > { %164 = dma.hbm_to_vmem [thread:$0]  (%p1264_p11), %s1762_s8, %s1751_s28, %s1764_s9, %s1754_s30, %s1669_s4, %s1669_s4, %s1670_s5  }
  0x37 PF: > { %167 = sbr.rel (!%p1732_p4) target bundleno = 90 (0x5a), region = 24  ;;  %s168_s6 = sand.u32 (%p1732_p4), 1, %s1634_s15  }
  0x38   : > { %s170_s7 = sand.u32 (%p1732_p4), 1, %s1630_s14   ;;  %s1269_s11 = sshll.u32 (%p1732_p4), %s1634_s15, 4 }
  0x39   : > { %s1268_s10 = sshll.u32 (%p1732_p4), %s170_s7, 7  ;;  %s174_s12 = ssub.s32 (%p1732_p4), 38, %s1269_s11 }
  0x3a   : > { %p175_p8 = scmp.lt.s32.totalorder (%p1732_p4), %s174_s12, 16  ;;  %s1799_s24 = scalar_lea.sflag (%p1732_p4), [#allocation5], %s168_s6 }
  0x3b   : > { %s172_s28 = scalar_lea.vmem (%p1732_p4), [#allocation4], %s1268_s10 }
  0x3e   : > { %s2698_s12 = smov (!%p175_p8, %s174_s12), 16 }
  0x3f   : > { %s1796_s18 = sshll.u32 %s2698_s12, 7 }
  0x40   : > { %s179_s19 = ssub.s32 2048, %s1796_s18 }
  0x41   : > { %180 = vsyncadd %s1799_s24, %s179_s19  ;;  %p1271_p11 = scmp.ne.s32.totalorder %s1796_s18, 0  ;;  %s1305_s30 = sshll.u32 %s1634_s15, 11 }
  0x42   : > { %s1807_s25 = scalar_lea.hbm %s2681_s1, %s1305_s30  ;;  %s185_s26 = sshll.u32 %s172_s28, 4  ;;  %s1809_s26 = int_to_ptr.vmem [resolvable:$true] %s185_s26 }
  0x43   : > { %s1508_s27 = scalar_lea.hbm %s1807_s25, %s1796_s18  ;;  %s1512_s5 = scalar_lea.hbm %s2681_s1, 4864 }
  0x44   : > { %p1509_p0 = scmp.ne.s32.totalorder %s1807_s25, %s1508_s27  ;;  %p1513_p9 = scmp.lt.u32.totalorder %s1807_s25, %s2681_s1 }
  0x45   : > { %p1514_p10 = scmp.lt.u32.totalorder %s1512_s5, %s1508_s27  ;;  %p1516_p13 = scmp.lt.u32.totalorder %s1508_s27, %s1807_s25 }
  0x46   : > { %p1510_p5 = pnand %p1509_p0, %p1271_p11 }
  0x47   : > { %p1515_p12 = por %p1514_p10, %p1513_p9 }
  0x48   : > { %p1511_p6 = pneg %p1510_p5 }
  0x49   : > { %p1517_p1 = por %p1516_p13, %p1515_p12 }
  0x4b   : > { %p1518_p2 = pnand %p1517_p1, %p1511_p6 }
  0x4d   : > { %1521 = shalt.err (!%p1518_p2)
}
  0x4e   : > { %s1522_s10 = scalar_lea.vmem %s1809_s26, %s1796_s18  ;;  %s1671_s11 = smov [#allocation4]  }
  0x4f   : > { %p1523_p3 = scmp.ne.s32.totalorder %s1809_s26, %s1522_s10  ;;  %s1526_s12 = sshll.u32 %s1671_s11, 4  ;;  %s1527_s12 = int_to_ptr.vmem [resolvable:$false] %s1526_s12 }
  0x50   : > { %s1528_s19 = scalar_lea.vmem %s1527_s12, 4096  ;;  %p1529_p5 = scmp.lt.s32.totalorder %s1809_s26, %s1527_s12 }
  0x51   : > { %p1524_p8 = pnand %p1523_p3, %p1271_p11  ;;  %p1530_p9 = scmp.lt.s32.totalorder %s1528_s19, %s1522_s10 }
  0x53   : > { %p1525_p0 = pneg %p1524_p8  ;;  %p1531_p10 = por %p1530_p9, %p1529_p5 }
  0x55   : > { %p1532_p12 = pnand %p1531_p10, %p1525_p0 }
  0x57   : > { %1535 = shalt.err (!%p1532_p12)
}
  0x58   : > { %s1672_s28 = smov 128   ;;  %s1673_s30 = smov 8  }
  0x59   : > { %191 = dma.hbm_to_vmem [thread:$0]  (%p1271_p11), %s1807_s25, %s1796_s18, %s1809_s26, %s1799_s24, %s1672_s28, %s1672_s28, %s1673_s30  }
  0x5a PF: > { %194 = sbr.rel (!%p1732_p4) target bundleno = 125 (0x7d), region = 28  ;;  %s195_s8 = sand.u32 (%p1732_p4), 1, %s1634_s15  }
  0x5b   : > { %s197_s9 = sand.u32 (%p1732_p4), 1, %s1630_s14   ;;  %s1276_s29 = sshll.u32 (%p1732_p4), %s1634_s15, 4 }
  0x5c   : > { %s1275_s27 = sshll.u32 (%p1732_p4), %s197_s9, 7  ;;  %s201_s4 = ssub.s32 (%p1732_p4), 38, %s1276_s29 }
  0x5d   : > { %p202_p6 = scmp.lt.s32.totalorder (%p1732_p4), %s201_s4, 16  ;;  %s1844_s7 = scalar_lea.sflag (%p1732_p4), [#allocation5], %s195_s8 }
  0x5e   : > { %s199_s18 = scalar_lea.vmem (%p1732_p4), [#allocation6], %s1275_s27 }
  0x61   : > { %s2700_s4 = smov (!%p202_p6, %s201_s4), 16 }
  0x62   : > { %s1841_s5 = sshll.u32 %s2700_s4, 7 }
  0x63   : > { %s206_s6 = ssub.s32 2048, %s1841_s5 }
  0x64   : > { %207 = vsyncadd %s1844_s7, %s206_s6  ;;  %p1278_p4 = scmp.ne.s32.totalorder %s1841_s5, 0  ;;  %s1306_s21 = sshll.u32 %s1634_s15, 11 }
  0x65   : > { %s1852_s26 = scalar_lea.hbm %s2682_s2, %s1306_s21  ;;  %s212_s10 = sshll.u32 %s199_s18, 4  ;;  %s1854_s10 = int_to_ptr.vmem [resolvable:$true] %s212_s10 }
  0x66   : > { %s1536_s11 = scalar_lea.hbm %s1852_s26, %s1841_s5  ;;  %s1540_s28 = scalar_lea.hbm %s2682_s2, 4864 }
  0x67   : > { %p1537_p11 = scmp.ne.s32.totalorder %s1852_s26, %s1536_s11  ;;  %p1541_p2 = scmp.lt.u32.totalorder %s1852_s26, %s2682_s2 }
  0x68   : > { %p1542_p3 = scmp.lt.u32.totalorder %s1540_s28, %s1536_s11  ;;  %p1544_p0 = scmp.lt.u32.totalorder %s1536_s11, %s1852_s26 }
  0x69   : > { %p1538_p13 = pnand %p1537_p11, %p1278_p4 }
  0x6a   : > { %p1543_p8 = por %p1542_p3, %p1541_p2 }
  0x6b   : > { %p1539_p1 = pneg %p1538_p13 }
  0x6c   : > { %p1545_p5 = por %p1544_p0, %p1543_p8 }
  0x6e   : > { %p1546_p9 = pnand %p1545_p5, %p1539_p1 }
  0x70   : > { %1549 = shalt.err (!%p1546_p9)
}
  0x71   : > { %s1550_s9 = scalar_lea.vmem %s1854_s10, %s1841_s5  ;;  %s1674_s27 = smov [#allocation6]  }
  0x72   : > { %p1551_p10 = scmp.ne.s32.totalorder %s1854_s10, %s1550_s9  ;;  %s1554_s29 = sshll.u32 %s1674_s27, 4  ;;  %s1555_s29 = int_to_ptr.vmem [resolvable:$false] %s1554_s29 }
  0x73   : > { %s1556_s4 = scalar_lea.vmem %s1555_s29, 4096  ;;  %p1557_p11 = scmp.lt.s32.totalorder %s1854_s10, %s1555_s29 }
  0x74   : > { %p1552_p12 = pnand %p1551_p10, %p1278_p4  ;;  %p1558_p13 = scmp.lt.s32.totalorder %s1556_s4, %s1550_s9 }
  0x76   : > { %p1553_p6 = pneg %p1552_p12  ;;  %p1559_p2 = por %p1558_p13, %p1557_p11 }
  0x78   : > { %p1560_p3 = pnand %p1559_p2, %p1553_p6 }
  0x7a   : > { %1563 = shalt.err (!%p1560_p3)
}
  0x7b   : > { %s1675_s6 = smov 128   ;;  %s1676_s18 = smov 8  }
  0x7c   : > { %218 = dma.hbm_to_vmem [thread:$0]  (%p1278_p4), %s1852_s26, %s1841_s5, %s1854_s10, %s1844_s7, %s1675_s6, %s1675_s6, %s1676_s18  }
  0x7d PF: > { %p1282_p1 = scmp.ge.s32.totalorder %s1634_s15, 1  ;;  %p220_p8 = scmp.lt.s32.totalorder %s1634_s15, 4 }
  0x7f   : > { %p221_p0 = pnand %p1282_p1, %p220_p8 }
  0x80   : > { %s226_s21 = sand.u32 (!%p221_p0), 1, %s1626_s13  }
  0x81   : > { %224 = sbr.rel (%p221_p0) target bundleno = 442 (0x1ba), region = 32  ;;  %s1884_s24 = sshll.u32 (!%p221_p0), %s226_s21, 7 }
  0x82   : > { %s227_s25 = scalar_lea.sflag (!%p221_p0), [#allocation3], %s226_s21  ;;  %s1887_s11 = scalar_lea.vmem (!%p221_p0), [#allocation2], %s1884_s24 }
  0x88   : > { %1613 = dma.done.wait (%p1738_p7), %s227_s25, 2048  }
  0x89   : > { %1615 = vsyncadd (%p1738_p7), %s227_s25, 4294965248  ;;  %s235_s15 = sand.u32 1, %s1717_s16   ;;  %s1895_s7 = scalar_lea.vmem [#allocation4], %s1884_s24 }
  0x8a   : > { %s236_s5 = scalar_lea.sflag [#allocation5], %s235_s15 }
  0x8b   : > { %1617 = dma.done.wait (%p1738_p7), %s236_s5, 4096  }
  0x8c   : > { %1619 = vsyncadd (%p1738_p7), %s236_s5, 4294963200  ;;  %v1902_v0 = vld [vmem:[%s1887_s11 + $0x10] sm:$0xff]  ;;  %v1906_v2 = vld [vmem:[%s1887_s11] sm:$0xff]  ;;  %s1982_s22 = scalar_lea.vmem [#allocation6], %s1884_s24  ;;  %vm844_vm0 = vcmask 7168   ;;  %s2031_s26 = scalar_lea.vmem [#allocation7], %s1884_s24  }
  0x8d   : > { %v318_v1 = vld [vmem:[%s1895_s7 + $0x10] sm:$0xff]  ;;  %v316_v4 = vld [vmem:[%s1895_s7] sm:$0xff]  ;;  %v1911_v5 = vld [vmem:[%s1887_s11 + $0x18] sm:$0xff]  ;;  %p2687_p7 = scmp.ne.s32.totalorder %s2686_s23, 0 }
  0x8e   : > { %v350_v3 = vsub.f32 %v1902_v0, %v318_v1  ;;  %v319_v6 = vld [vmem:[%s1895_s7 + $0x18] sm:$0xff]  ;;  %v348_v7 = vsub.f32 %v1906_v2, %v316_v4  ;;  %v1917_v9 = vld [vmem:[%s1887_s11 + $0x8] sm:$0xff]  ;;  %v1926_v15 = vld [vmem:[%s1887_s11 + $0x20] sm:$0xff]  ;;  %s1288_s10 = sshll.u32 (%p2687_p7), %s1717_s16, 4  ;;  %s1307_s12 = sshll.u32 (%p2687_p7), %s1717_s16, 7 }
  0x8f   : > { %v351_v8 = vsub.f32 %v1911_v5, %v319_v6  ;;  %v317_v10 = vld [vmem:[%s1895_s7 + $0x8] sm:$0xff]  ;;  %v320_v16 = vld [vmem:[%s1895_s7 + $0x20] sm:$0xff]  ;;  %v1932_v21 = vld [vmem:[%s1887_s11 + $0x38] sm:$0xff]  ;;  %s937_s19 = ssub.s32 (%p2687_p7), 38, %s1288_s10  ;;  %s2584_s8 = scalar_lea.vmem (%p2687_p7), %s2683_s3, %s1307_s12  }
  0x90   : > { %v1921_v11 = vld [vmem:[%s1887_s11 + $0x28] sm:$0xff]  ;;  %v366_v12 = vadd.f32 1e-06, %v350_v3  ;;  %v349_v13 = vsub.f32 %v1917_v9, %v317_v10  ;;  %v364_v17 = vadd.f32 1e-06, %v348_v7  ;;  %v352_v20 = vsub.f32 %v1926_v15, %v320_v16  ;;  %v323_v22 = vld [vmem:[%s1895_s7 + $0x38] sm:$0xff] }
  0x91   : > { %v321_v14 = vld [vmem:[%s1895_s7 + $0x28] sm:$0xff]  ;;  %v367_v18 = vadd.f32 1e-06, %v351_v8  ;;  %v1936_v25 = vld [vmem:[%s1887_s11 + $0x30] sm:$0xff]  ;;  %v355_v30 = vsub.f32 %v1932_v21, %v323_v22  ;;  %v1946_v36 = vld [vmem:[%s1887_s11 + $0x40] sm:$0xff]  ;;  %p938_p4 = scmp.lt.s32.totalorder (%p2687_p7), %s937_s19, 16 }
  0x92   : > { %v353_v19 = vsub.f32 %v1921_v11, %v321_v14  ;;  %v414_v23 = vmul.f32 %v366_v12, %v366_v12  ;;  %v365_v24 = vadd.f32 1e-06, %v349_v13  ;;  %v322_v26 = vld [vmem:[%s1895_s7 + $0x30] sm:$0xff]  ;;  %v412_v27 = vmul.f32 %v364_v17, %v364_v17  ;;  %v1942_v34 = vld [vmem:[%s1887_s11 + $0x48] sm:$0xff]  ;;  %v324_v37 = vld [vmem:[%s1895_s7 + $0x40] sm:$0xff] }
  0x93   : > { %v415_v28 = vmul.f32 %v367_v18, %v367_v18  ;;  %v368_v32 = vadd.f32 1e-06, %v352_v20  ;;  %v354_v33 = vsub.f32 %v1936_v25, %v322_v26  ;;  %v325_v35 = vld [vmem:[%s1895_s7 + $0x48] sm:$0xff]  ;;  %v371_v39 = vadd.f32 1e-06, %v355_v30  ;;  %v1952_v44 = vld [vmem:[%s1887_s11 + $0x58] sm:$0xff] }
  0x94   : > { %432 = vadd.xlane.f32.xlu1 %v414_v23  ;;  %v369_v29 = vadd.f32 1e-06, %v353_v19  ;;  %428 = vadd.xlane.f32.xlu0 %v412_v27  ;;  %v413_v31 = vmul.f32 %v365_v24, %v365_v24  ;;  %v357_v40 = vsub.f32 %v1942_v34, %v325_v35  ;;  %v356_v43 = vsub.f32 %v1946_v36, %v324_v37  ;;  %v327_v45 = vld [vmem:[%s1895_s7 + $0x58] sm:$0xff]  ;;  %v1956_v46 = vld [vmem:[%s1887_s11 + $0x50] sm:$0xff]  ;;  %v1962_v54 = vld [vmem:[%s1887_s11 + $0x68] sm:$0xff] }
  0x95   : > { %v416_v41 = vmul.f32 %v368_v32, %v368_v32  ;;  %v370_v42 = vadd.f32 1e-06, %v354_v33  ;;  %v326_v47 = vld [vmem:[%s1895_s7 + $0x50] sm:$0xff]  ;;  %v419_v48 = vmul.f32 %v371_v39, %v371_v39  ;;  %v359_v50 = vsub.f32 %v1952_v44, %v327_v45  ;;  %v329_v55 = vld [vmem:[%s1895_s7 + $0x68] sm:$0xff]  ;;  %v1966_v56 = vld [vmem:[%s1887_s11 + $0x60] sm:$0xff] }
  0x96   : > { %v417_v38 = vmul.f32 %v369_v29, %v369_v29  ;;  %v373_v49 = vadd.f32 1e-06, %v357_v40  ;;  %v372_v52 = vadd.f32 1e-06, %v356_v43  ;;  %v358_v53 = vsub.f32 %v1956_v46, %v326_v47  ;;  %v328_v57 = vld [vmem:[%s1895_s7 + $0x60] sm:$0xff]  ;;  %v1972_v1 = vld [vmem:[%s1887_s11 + $0x78] sm:$0xff] }
  0x97   : > { %v418_v51 = vmul.f32 %v370_v42, %v370_v42  ;;  %v375_v59 = vadd.f32 1e-06, %v359_v50  ;;  %v361_v60 = vsub.f32 %v1962_v54, %v329_v55  ;;  %v360_v63 = vsub.f32 %v1966_v56, %v328_v57  ;;  %v331_v3 = vld [vmem:[%s1895_s7 + $0x78] sm:$0xff]  ;;  %v1976_v4 = vld [vmem:[%s1887_s11 + $0x70] sm:$0xff]  ;;  %v333_v16 = vld [vmem:[%s1982_s22 + $0x8] sm:$0xff] }
  0x98   : > { %434 = vadd.xlane.f32.xlu1 %v415_v28  ;;  %430 = vadd.xlane.f32.xlu0 %v413_v31  ;;  %v421_v58 = vmul.f32 %v373_v49, %v373_v49  ;;  %v420_v61 = vmul.f32 %v372_v52, %v372_v52  ;;  %v374_v62 = vadd.f32 1e-06, %v358_v53  ;;  %v330_v6 = vld [vmem:[%s1895_s7 + $0x70] sm:$0xff]  ;;  %v363_v10 = vsub.f32 %v1972_v1, %v331_v3  ;;  %v332_v17 = vld [vmem:[%s1982_s22] sm:$0xff]  ;;  %v335_v26 = vld [vmem:[%s1982_s22 + $0x18] sm:$0xff] }
  0x99   : > { %v423_v7 = vmul.f32 %v375_v59, %v375_v59  ;;  %v377_v8 = vadd.f32 1e-06, %v361_v60  ;;  %v376_v13 = vadd.f32 1e-06, %v360_v63  ;;  %v362_v14 = vsub.f32 %v1976_v4, %v330_v6  ;;  %v334_v27 = vld [vmem:[%s1982_s22 + $0x10] sm:$0xff]  ;;  %v337_v33 = vld [vmem:[%s1982_s22 + $0x28] sm:$0xff] }
  0x9a   : > { %v422_v12 = vmul.f32 %v374_v62, %v374_v62  ;;  %v379_v19 = vadd.f32 1e-06, %v363_v10  ;;  %v381_v20 = vsub.f32 %v1917_v9, %v333_v16  ;;  %v380_v24 = vsub.f32 %v1906_v2, %v332_v17  ;;  %v336_v35 = vld [vmem:[%s1982_s22 + $0x20] sm:$0xff]  ;;  %v338_v42 = vld [vmem:[%s1982_s22 + $0x30] sm:$0xff]  ;;  %v341_v49 = vld [vmem:[%s1982_s22 + $0x48] sm:$0xff] }
  0x9b   : > { %v425_v18 = vmul.f32 %v377_v8, %v377_v8  ;;  %v424_v22 = vmul.f32 %v376_v13, %v376_v13  ;;  %v378_v23 = vadd.f32 1e-06, %v362_v14  ;;  %v383_v30 = vsub.f32 %v1911_v5, %v335_v26  ;;  %v340_v50 = vld [vmem:[%s1982_s22 + $0x40] sm:$0xff]  ;;  %v343_v57 = vld [vmem:[%s1982_s22 + $0x58] sm:$0xff]  ;;  %v345_v63 = vld [vmem:[%s1982_s22 + $0x68] sm:$0xff] }
  0x9c   : > { %438 = vadd.xlane.f32.xlu1 %v417_v38  ;;  %436 = vadd.xlane.f32.xlu0 %v416_v41  ;;  %v427_v28 = vmul.f32 %v379_v19, %v379_v19  ;;  %v397_v29 = vadd.f32 1e-06, %v381_v20  ;;  %v396_v32 = vadd.f32 1e-06, %v380_v24  ;;  %v382_v9 = vsub.f32 %v1902_v0, %v334_v27  ;;  %v339_v41 = vld [vmem:[%s1982_s22 + $0x38] sm:$0xff]  ;;  %v344_v3 = vld [vmem:[%s1982_s22 + $0x60] sm:$0xff] }
  0x9d   : > { %v426_v31 = vmul.f32 %v378_v23, %v378_v23  ;;  %v399_v38 = vadd.f32 1e-06, %v383_v30  ;;  %v385_v2 = vsub.f32 %v1921_v11, %v337_v33  ;;  %v384_v5 = vsub.f32 %v1926_v15, %v336_v35  ;;  %v347_v13 = vld [vmem:[%s1982_s22 + $0x78] sm:$0xff] }
  0x9e   : > { %v573_v37 = vmul.f32 %v397_v29, %v397_v29  ;;  %v572_v39 = vmul.f32 %v396_v32, %v396_v32  ;;  %v398_v40 = vadd.f32 1e-06, %v382_v9  ;;  %v387_v0 = vsub.f32 %v1932_v21, %v339_v41 }
  0x9f   : > { %v575_v43 = vmul.f32 %v399_v38, %v399_v38  ;;  %v401_v45 = vadd.f32 1e-06, %v385_v2  ;;  %v386_v11 = vsub.f32 %v1936_v25, %v338_v42  ;;  %v389_v15 = vsub.f32 %v1942_v34, %v341_v49 }
  0xa0   : > { %442 = vadd.xlane.f32.xlu1 %v419_v48  ;;  %440 = vadd.xlane.f32.xlu0 %v418_v51  ;;  %v574_v47 = vmul.f32 %v398_v40, %v398_v40  ;;  %v400_v48 = vadd.f32 1e-06, %v384_v5  ;;  %v403_v52 = vadd.f32 1e-06, %v387_v0  ;;  %v388_v21 = vsub.f32 %v1946_v36, %v340_v50 }
  0xa1   : > { %v577_v51 = vmul.f32 %v401_v45, %v401_v45  ;;  %v402_v55 = vadd.f32 1e-06, %v386_v11  ;;  %v405_v60 = vadd.f32 1e-06, %v389_v15  ;;  %v391_v25 = vsub.f32 %v1952_v44, %v343_v57  ;;  %v346_v44 = vld [vmem:[%s1982_s22 + $0x70] sm:$0xff] }
  0xa2   : > { %v576_v53 = vmul.f32 %v400_v48, %v400_v48  ;;  %v579_v59 = vmul.f32 %v403_v52, %v403_v52  ;;  %v404_v62 = vadd.f32 1e-06, %v388_v21  ;;  %v393_v36 = vsub.f32 %v1962_v54, %v345_v63 }
  0xa3   : > { %v581_v6 = vmul.f32 %v405_v60, %v405_v60  ;;  %v395_v17 = vsub.f32 %v1972_v1, %v347_v13  ;;  %v394_v19 = vsub.f32 %v1976_v4, %v346_v44 }
  0xa4   : > { %446 = vadd.xlane.f32.xlu1 %v421_v58  ;;  %444 = vadd.xlane.f32.xlu0 %v420_v61  ;;  %v342_v58 = vld [vmem:[%s1982_s22 + $0x50] sm:$0xff]  ;;  %v578_v61 = vmul.f32 %v402_v55, %v402_v55  ;;  %v580_v8 = vmul.f32 %v404_v62, %v404_v62  ;;  %v409_v16 = vadd.f32 1e-06, %v393_v36 }
  0xa5   : > { %v390_v34 = vsub.f32 %v1956_v46, %v342_v58  ;;  %v411_v54 = vadd.f32 1e-06, %v395_v17  ;;  %v410_v23 = vadd.f32 1e-06, %v394_v19 }
  0xa6   : > { %v585_v20 = vmul.f32 %v409_v16, %v409_v16 }
  0xa7   : > { %v406_v10 = vadd.f32 1e-06, %v390_v34  ;;  %v586_v24 = vmul.f32 %v410_v23, %v410_v23 }
  0xa8   : > { %450 = vadd.xlane.f32.xlu1 %v423_v7  ;;  %448 = vadd.xlane.f32.xlu0 %v422_v12  ;;  %v407_v7 = vadd.f32 1e-06, %v391_v25  ;;  %v392_v12 = vsub.f32 %v1966_v56, %v344_v3  ;;  %v587_v56 = vmul.f32 %v411_v54, %v411_v54 }
  0xa9   : > { %v582_v46 = vmul.f32 %v406_v10, %v406_v10 }
  0xaa   : > { %v583_v14 = vmul.f32 %v407_v7, %v407_v7 }
  0xac   : > { %454 = vadd.xlane.f32.xlu1 %v425_v18  ;;  %452 = vadd.xlane.f32.xlu0 %v424_v22  ;;  %v408_v18 = vadd.f32 1e-06, %v392_v12 }
  0xae   : > { %v584_v22 = vmul.f32 %v408_v18, %v408_v18 }
  0xb0   : > { %458 = vadd.xlane.f32.xlu1 %v427_v28  ;;  %456 = vadd.xlane.f32.xlu0 %v426_v31 }
  0xb4   : > { %590 = vadd.xlane.f32.xlu1 %v573_v37  ;;  %588 = vadd.xlane.f32.xlu0 %v572_v39 }
  0xb8   : > { %594 = vadd.xlane.f32.xlu1 %v575_v43  ;;  %592 = vadd.xlane.f32.xlu0 %v574_v47 }
  0xbc   : > { %598 = vadd.xlane.f32.xlu1 %v577_v51  ;;  %596 = vadd.xlane.f32.xlu0 %v576_v53 }
  0xc0   : > { %602 = vadd.xlane.f32.xlu1 %v579_v59  ;;  %600 = vadd.xlane.f32.xlu0 %v578_v61 }
  0xc4   : > { %606 = vadd.xlane.f32.xlu1 %v581_v6  ;;  %604 = vadd.xlane.f32.xlu0 %v580_v8 }
  0xc8   : > { %610 = vadd.xlane.f32.xlu1 %v583_v14  ;;  %608 = vadd.xlane.f32.xlu0 %v582_v46 }
  0xcc   : > { %614 = vadd.xlane.f32.xlu1 %v585_v20  ;;  %612 = vadd.xlane.f32.xlu0 %v584_v22 }
  0xd0   : > { %618 = vadd.xlane.f32.xlu1 %v587_v56  ;;  %616 = vadd.xlane.f32.xlu0 %v586_v24 }
 0x121   : > { %v433_v26 = vpop.xlane.xlu1 %432  ;;  %v429_v1 = vpop.xlane.xlu0 %428 }
 0x122   : > { %1416 = vrsqrt.f32 %v433_v26  ;;  %vm476_vm1 = vcmp.eq.f32.partialorder %v433_v26, inf  ;;  %vm478_vm2 = vcmp.eq.f32.partialorder %v433_v26, 0.0  ;;  %v479_v33 = vand.u32 2147483648, %v433_v26 }
 0x123   : > { %1418 = vrsqrt.f32 %v429_v1  ;;  %vm462_vm3 = vcmp.eq.f32.partialorder %v429_v1, inf  ;;  %v465_v2 = vand.u32 2147483648, %v429_v1  ;;  %vm464_vm4 = vcmp.eq.f32.partialorder %v429_v1, 0.0 }
 0x125   : > { %v435_v27 = vpop.xlane.xlu1 %434  ;;  %v431_v28 = vpop.xlane.xlu0 %430 }
 0x126   : > { %1420 = vrsqrt.f32 %v435_v27  ;;  %vm483_vm5 = vcmp.eq.f32.partialorder %v435_v27, inf  ;;  %vm485_vm6 = vcmp.eq.f32.partialorder %v435_v27, 0.0  ;;  %v486_v0 = vand.u32 2147483648, %v435_v27 }
 0x127   : > { %1422 = vrsqrt.f32 %v431_v28  ;;  %vm469_vm7 = vcmp.eq.f32.partialorder %v431_v28, inf  ;;  %v472_v49 = vand.u32 2147483648, %v431_v28  ;;  %vm471_vm8 = vcmp.eq.f32.partialorder %v431_v28, 0.0 }
 0x129   : > { %v2016_v4 = vpop.xlane.xlu1 %438  ;;  %v2019_v29 = vpop.xlane.xlu0 %436 }
 0x12a   : > { %1424 = vrsqrt.f32 %v2016_v4  ;;  %vm497_vm9 = vcmp.eq.f32.partialorder %v2016_v4, inf  ;;  %vm499_vm10 = vcmp.eq.f32.partialorder %v2016_v4, 0.0  ;;  %v500_v57 = vand.u32 2147483648, %v2016_v4 }
 0x12b   : > { %1426 = vrsqrt.f32 %v2019_v29  ;;  %vm490_vm11 = vcmp.eq.f32.partialorder %v2019_v29, inf  ;;  %v493_v25 = vand.u32 2147483648, %v2019_v29  ;;  %vm492_vm12 = vcmp.eq.f32.partialorder %v2019_v29, 0.0 }
 0x12c   : > { %v1417_v30 = vpop.eup %1416 }
 0x12d   : > { %v1419_v31 = vpop.eup %1418  ;;  %v475_v32 = vmul.f32 %v1417_v30, %v433_v26  ;;  %v2022_v9 = vpop.xlane.xlu1 %442 }
 0x12e   : > { %v461_v35 = vmul.f32 %v1419_v31, %v429_v1  ;;  %1428 = vrsqrt.f32 %v2022_v9  ;;  %v2025_v37 = vpop.xlane.xlu0 %440  ;;  %vm511_vm13 = vcmp.eq.f32.partialorder %v2022_v9, inf  ;;  %vm513_vm14 = vcmp.eq.f32.partialorder %v2022_v9, 0.0 }
 0x12f   : > { %v477_v38 = vsel %vm476_vm1, %v433_v26, %v475_v32  ;;  %1430 = vrsqrt.f32 %v2025_v37  ;;  %v514_v36 = vand.u32 2147483648, %v2022_v9  ;;  %vm504_vm15 = vcmp.eq.f32.partialorder %v2025_v37, inf }
 0x130   : > { %v1421_v39 = vpop.eup %1420  ;;  %v2028_v40 = vsel %vm478_vm2, %v479_v33, %v477_v38  ;;  %v463_v5 = vsel %vm462_vm3, %v429_v1, %v461_v35  ;;  %v507_v13 = vand.u32 2147483648, %v2025_v37  ;;  %vm506_vm1 = vcmp.eq.f32.partialorder %v2025_v37, 0.0 }
 0x131   : > { %v1423_v41 = vpop.eup %1422  ;;  %847 = vst.msk [vmem:[%s2031_s26 + $0x10] sm:$0xff] %vm844_vm0, %v2028_v40  ;;  %v2036_v42 = vsel %vm464_vm4, %v465_v2, %v463_v5  ;;  %v482_v43 = vmul.f32 %v1421_v39, %v435_v27  ;;  %v2038_v45 = vpop.xlane.xlu1 %446 }
 0x132   : > { %845 = vst.msk [vmem:[%s2031_s26] sm:$0xff] %vm844_vm0, %v2036_v42  ;;  %v468_v47 = vmul.f32 %v1423_v41, %v431_v28  ;;  %1432 = vrsqrt.f32 %v2038_v45  ;;  %v2044_v48 = vpop.xlane.xlu0 %444  ;;  %vm525_vm2 = vcmp.eq.f32.partialorder %v2038_v45, inf  ;;  %vm527_vm3 = vcmp.eq.f32.partialorder %v2038_v45, 0.0 }
 0x133   : > { %v484_v11 = vsel %vm483_vm5, %v435_v27, %v482_v43  ;;  %1434 = vrsqrt.f32 %v2044_v48  ;;  %v528_v20 = vand.u32 2147483648, %v2038_v45  ;;  %vm518_vm4 = vcmp.eq.f32.partialorder %v2044_v48, inf }
 0x134   : > { %v1425_v50 = vpop.eup %1424  ;;  %v2047_v51 = vsel %vm485_vm6, %v486_v0, %v484_v11  ;;  %v470_v52 = vsel %vm469_vm7, %v431_v28, %v468_v47  ;;  %v521_v56 = vand.u32 2147483648, %v2044_v48  ;;  %vm520_vm5 = vcmp.eq.f32.partialorder %v2044_v48, 0.0 }
 0x135   : > { %v1427_v15 = vpop.eup %1426  ;;  %848 = vst.msk [vmem:[%s2031_s26 + $0x18] sm:$0xff] %vm844_vm0, %v2047_v51  ;;  %v2052_v53 = vsel %vm471_vm8, %v472_v49, %v470_v52  ;;  %v496_v55 = vmul.f32 %v1425_v50, %v2016_v4  ;;  %v2056_v21 = vpop.xlane.xlu1 %450 }
 0x136   : > { %846 = vst.msk [vmem:[%s2031_s26 + $0x8] sm:$0xff] %vm844_vm0, %v2052_v53  ;;  %v489_v58 = vmul.f32 %v1427_v15, %v2019_v29  ;;  %1436 = vrsqrt.f32 %v2056_v21  ;;  %v2065_v59 = vpop.xlane.xlu0 %448  ;;  %vm539_vm6 = vcmp.eq.f32.partialorder %v2056_v21, inf  ;;  %vm541_vm7 = vcmp.eq.f32.partialorder %v2056_v21, 0.0 }
 0x137   : > { %v498_v60 = vsel %vm497_vm9, %v2016_v4, %v496_v55  ;;  %1438 = vrsqrt.f32 %v2065_v59  ;;  %v542_v30 = vand.u32 2147483648, %v2056_v21  ;;  %vm532_vm8 = vcmp.eq.f32.partialorder %v2065_v59, inf }
 0x138   : > { %v1429_v61 = vpop.eup %1428  ;;  %v2071_v62 = vsel %vm499_vm10, %v500_v57, %v498_v60  ;;  %v491_v34 = vsel %vm490_vm11, %v2019_v29, %v489_v58  ;;  %vm534_vm9 = vcmp.eq.f32.partialorder %v2065_v59, 0.0  ;;  %v535_v33 = vand.u32 2147483648, %v2065_v59 }
 0x139   : > { %v1431_v63 = vpop.eup %1430  ;;  %850 = vst.msk [vmem:[%s2031_s26 + $0x28] sm:$0xff] %vm844_vm0, %v2071_v62  ;;  %v2078_v3 = vsel %vm492_vm12, %v493_v25, %v491_v34  ;;  %v510_v6 = vmul.f32 %v1429_v61, %v2022_v9  ;;  %v2082_v7 = vpop.xlane.xlu1 %454 }
 0x13a   : > { %849 = vst.msk [vmem:[%s2031_s26 + $0x20] sm:$0xff] %vm844_vm0, %v2078_v3  ;;  %v503_v8 = vmul.f32 %v1431_v63, %v2025_v37  ;;  %1440 = vrsqrt.f32 %v2082_v7  ;;  %v2091_v10 = vpop.xlane.xlu0 %452  ;;  %vm553_vm10 = vcmp.eq.f32.partialorder %v2082_v7, inf  ;;  %vm555_vm11 = vcmp.eq.f32.partialorder %v2082_v7, 0.0 }
 0x13b   : > { %v512_v12 = vsel %vm511_vm13, %v2022_v9, %v510_v6  ;;  %1442 = vrsqrt.f32 %v2091_v10  ;;  %v556_v41 = vand.u32 2147483648, %v2082_v7  ;;  %vm546_vm12 = vcmp.eq.f32.partialorder %v2091_v10, inf }
 0x13c   : > { %v1433_v44 = vpop.eup %1432  ;;  %v2097_v14 = vsel %vm513_vm14, %v514_v36, %v512_v12  ;;  %v505_v16 = vsel %vm504_vm15, %v2025_v37, %v503_v8  ;;  %vm548_vm13 = vcmp.eq.f32.partialorder %v2091_v10, 0.0  ;;  %v549_v0 = vand.u32 2147483648, %v2091_v10 }
 0x13d   : > { %v1435_v17 = vpop.eup %1434  ;;  %852 = vst.msk [vmem:[%s2031_s26 + $0x38] sm:$0xff] %vm844_vm0, %v2097_v14  ;;  %v2104_v46 = vsel %vm506_vm1, %v507_v13, %v505_v16  ;;  %v524_v18 = vmul.f32 %v1433_v44, %v2038_v45  ;;  %v2108_v19 = vpop.xlane.xlu1 %458  ;;  %vm861_vm14 = vcmask 15368  }
 0x13e   : > { %851 = vst.msk [vmem:[%s2031_s26 + $0x30] sm:$0xff] %vm844_vm0, %v2104_v46  ;;  %v517_v54 = vmul.f32 %v1435_v17, %v2044_v48  ;;  %1444 = vrsqrt.f32 %v2108_v19  ;;  %v2117_v22 = vpop.xlane.xlu0 %456  ;;  %vm567_vm15 = vcmp.eq.f32.partialorder %v2108_v19, inf  ;;  %vm569_vm1 = vcmp.eq.f32.partialorder %v2108_v19, 0.0 }
 0x13f   : > { %v526_v23 = vsel %vm525_vm2, %v2038_v45, %v524_v18  ;;  %1446 = vrsqrt.f32 %v2117_v22  ;;  %v570_v52 = vand.u32 2147483648, %v2108_v19  ;;  %vm560_vm2 = vcmp.eq.f32.partialorder %v2117_v22, inf }
 0x140   : > { %v1437_v24 = vpop.eup %1436  ;;  %v2123_v26 = vsel %vm527_vm3, %v528_v20, %v526_v23  ;;  %v519_v1 = vsel %vm518_vm4, %v2044_v48, %v517_v54  ;;  %vm562_vm3 = vcmp.eq.f32.partialorder %v2117_v22, 0.0  ;;  %v563_v57 = vand.u32 2147483648, %v2117_v22 }
 0x141   : > { %v1439_v27 = vpop.eup %1438  ;;  %854 = vst.msk [vmem:[%s2031_s26 + $0x48] sm:$0xff] %vm844_vm0, %v2123_v26  ;;  %v2130_v28 = vsel %vm520_vm5, %v521_v56, %v519_v1  ;;  %v538_v4 = vmul.f32 %v1437_v24, %v2056_v21  ;;  %v2135_v29 = vpop.xlane.xlu1 %590  ;;  %vm878_vm4 = vcmask 23568  }
 0x142   : > { %853 = vst.msk [vmem:[%s2031_s26 + $0x40] sm:$0xff] %vm844_vm0, %v2130_v28  ;;  %v531_v31 = vmul.f32 %v1439_v27, %v2065_v59  ;;  %1448 = vrsqrt.f32 %v2135_v29  ;;  %v2144_v32 = vpop.xlane.xlu0 %588  ;;  %vm629_vm5 = vcmp.eq.f32.partialorder %v2135_v29, inf  ;;  %v632_v61 = vand.u32 2147483648, %v2135_v29 }
 0x143   : > { %v540_v9 = vsel %vm539_vm6, %v2056_v21, %v538_v4  ;;  %1450 = vrsqrt.f32 %v2144_v32  ;;  %vm631_vm6 = vcmp.eq.f32.partialorder %v2135_v29, 0.0 }
 0x144   : > { %v1441_v35 = vpop.eup %1440  ;;  %v2150_v37 = vsel %vm541_vm7, %v542_v30, %v540_v9  ;;  %v533_v38 = vsel %vm532_vm8, %v2065_v59, %v531_v31  ;;  %vm622_vm7 = vcmp.eq.f32.partialorder %v2144_v32, inf  ;;  %vm895_vm8 = vcmask 31768  }
 0x145   : > { %v1443_v2 = vpop.eup %1442  ;;  %856 = vst.msk [vmem:[%s2031_s26 + $0x58] sm:$0xff] %vm844_vm0, %v2150_v37  ;;  %v2158_v39 = vsel %vm534_vm9, %v535_v33, %v533_v38  ;;  %v552_v5 = vmul.f32 %v1441_v35, %v2082_v7  ;;  %v2163_v43 = vpop.xlane.xlu1 %594  ;;  %vm624_vm9 = vcmp.eq.f32.partialorder %v2144_v32, 0.0 }
 0x146   : > { %855 = vst.msk [vmem:[%s2031_s26 + $0x50] sm:$0xff] %vm844_vm0, %v2158_v39  ;;  %v545_v45 = vmul.f32 %v1443_v2, %v2091_v10  ;;  %1452 = vrsqrt.f32 %v2163_v43  ;;  %v2172_v47 = vpop.xlane.xlu0 %592  ;;  %v646_v44 = vand.u32 2147483648, %v2163_v43 }
 0x147   : > { %v554_v48 = vsel %vm553_vm10, %v2082_v7, %v552_v5  ;;  %1454 = vrsqrt.f32 %v2172_v47  ;;  %v625_v7 = vand.u32 2147483648, %v2144_v32  ;;  %vm912_vm10 = vcmask 39968  }
 0x148   : > { %v1445_v11 = vpop.eup %1444  ;;  %v2182_v49 = vsel %vm555_vm11, %v556_v41, %v554_v48  ;;  %v547_v50 = vsel %vm546_vm12, %v2091_v10, %v545_v45  ;;  %vm643_vm11 = vcmp.eq.f32.partialorder %v2163_v43, inf  ;;  %vm645_vm12 = vcmp.eq.f32.partialorder %v2163_v43, 0.0 }
 0x149   : > { %v1447_v15 = vpop.eup %1446  ;;  %858 = vst.msk [vmem:[%s2031_s26 + $0x68] sm:$0xff] %vm844_vm0, %v2182_v49  ;;  %v2192_v55 = vsel %vm548_vm13, %v549_v0, %v547_v50  ;;  %v566_v21 = vmul.f32 %v1445_v11, %v2108_v19  ;;  %v2197_v58 = vpop.xlane.xlu1 %598  ;;  %vm636_vm13 = vcmp.eq.f32.partialorder %v2172_v47, inf  ;;  %v639_v18 = vand.u32 2147483648, %v2172_v47 }
 0x14a   : > { %857 = vst.msk [vmem:[%s2031_s26 + $0x60] sm:$0xff] %vm844_vm0, %v2192_v55  ;;  %v559_v59 = vmul.f32 %v1447_v15, %v2117_v22  ;;  %1456 = vrsqrt.f32 %v2197_v58  ;;  %v2206_v60 = vpop.xlane.xlu0 %596 }
 0x14b   : > { %v568_v25 = vsel %vm567_vm15, %v2108_v19, %v566_v21  ;;  %1458 = vrsqrt.f32 %v2206_v60  ;;  %vm638_vm15 = vcmp.eq.f32.partialorder %v2172_v47, 0.0  ;;  %v660_v19 = vand.u32 2147483648, %v2197_v58 }
 0x14c   : > { %v1449_v34 = vpop.eup %1448  ;;  %v2216_v63 = vsel %vm569_vm1, %v570_v52, %v568_v25  ;;  %v561_v6 = vsel %vm560_vm2, %v2117_v22, %v559_v59  ;;  %v653_v23 = vand.u32 2147483648, %v2206_v60  ;;  %vm650_vm1 = vcmp.eq.f32.partialorder %v2206_v60, inf }
 0x14d   : > { %v1451_v36 = vpop.eup %1450  ;;  %860 = vst.msk [vmem:[%s2031_s26 + $0x78] sm:$0xff] %vm844_vm0, %v2216_v63  ;;  %v2228_v8 = vsel %vm562_vm3, %v563_v57, %v561_v6  ;;  %v628_v10 = vmul.f32 %v1449_v34, %v2135_v29  ;;  %v2233_v12 = vpop.xlane.xlu1 %602  ;;  %vm659_vm2 = vcmp.eq.f32.partialorder %v2197_v58, 0.0  ;;  %vm652_vm3 = vcmp.eq.f32.partialorder %v2206_v60, 0.0 }
 0x14e   : > { %859 = vst.msk [vmem:[%s2031_s26 + $0x70] sm:$0xff] %vm844_vm0, %v2228_v8  ;;  %v621_v13 = vmul.f32 %v1451_v36, %v2144_v32  ;;  %1460 = vrsqrt.f32 %v2233_v12  ;;  %v2242_v16 = vpop.xlane.xlu0 %600  ;;  %vm657_vm0 = vcmp.eq.f32.partialorder %v2197_v58, inf  ;;  %v674_v33 = vand.u32 2147483648, %v2233_v12 }
 0x14f   : > { %v630_v17 = vsel %vm629_vm5, %v2135_v29, %v628_v10  ;;  %1462 = vrsqrt.f32 %v2242_v16  ;;  %vm671_vm5 = vcmp.eq.f32.partialorder %v2233_v12, inf  ;;  %v667_v6 = vand.u32 2147483648, %v2242_v16 }
 0x150   : > { %v1453_v20 = vpop.eup %1452  ;;  %v633_v54 = vsel %vm631_vm6, %v632_v61, %v630_v17  ;;  %v623_v22 = vsel %vm622_vm7, %v2144_v32, %v621_v13  ;;  %vm673_vm6 = vcmp.eq.f32.partialorder %v2233_v12, 0.0 }
 0x151   : > { %v1455_v56 = vpop.eup %1454  ;;  %v733_v24 = vsub.f32 %v633_v54, %v2052_v53  ;;  %v797_v1 = vsub.f32 %v2052_v53, %v633_v54  ;;  %863 = vst.msk [vmem:[%s2031_s26 + $0x8] sm:$0xff] %vm861_vm14, %v633_v54  ;;  %v626_v27 = vsel %vm624_vm9, %v625_v7, %v623_v22  ;;  %v642_v4 = vmul.f32 %v1453_v20, %v2163_v43  ;;  %v2266_v29 = vpop.xlane.xlu1 %606 }
 0x152   : > { %v732_v30 = vsub.f32 %v626_v27, %v2036_v42  ;;  %v796_v31 = vsub.f32 %v2036_v42, %v626_v27  ;;  %862 = vst.msk [vmem:[%s2031_s26] sm:$0xff] %vm861_vm14, %v626_v27  ;;  %v635_v53 = vmul.f32 %v1455_v56, %v2172_v47  ;;  %1464 = vrsqrt.f32 %v2266_v29  ;;  %v2314_v7 = vpop.xlane.xlu0 %604 }
 0x153   : > { %v749_v32 = vand.u32 2147483647, %v733_v24  ;;  %v813_v9 = vadd.f32 1.0, %v797_v1  ;;  %v644_v42 = vsel %vm643_vm11, %v2163_v43, %v642_v4  ;;  %v1677_v43 = vmov -1.0  }
 0x154   : > { %v1457_v35 = vpop.eup %1456  ;;  %v748_v38 = vand.u32 2147483647, %v732_v30  ;;  %v812_v2 = vadd.f32 1.0, %v796_v31  ;;  %v647_v5 = vsel %vm645_vm12, %v646_v44, %v644_v42  ;;  %v637_v41 = vsel %vm636_vm13, %v2172_v47, %v635_v53 }
 0x155   : > { %v1459_v45 = vpop.eup %1458  ;;  %vm765_vm7 = vcmp.le.f32.partialorder %v749_v32, 1.0  ;;  %v829_v0 = vmax.f32 %v813_v9, 0.0  ;;  %880 = vst.msk [vmem:[%s2031_s26 + $0x8] sm:$0xff] %vm878_vm4, %v749_v32  ;;  %v735_v48 = vsub.f32 %v647_v5, %v2047_v51  ;;  %v799_v11 = vsub.f32 %v2047_v51, %v647_v5  ;;  %v2362_v31 = vpop.xlane.xlu1 %610 }
 0x156   : > { %865 = vst.msk [vmem:[%s2031_s26 + $0x18] sm:$0xff] %vm861_vm14, %v647_v5  ;;  %v781_v50 = vsel %vm765_vm7, 1.0, %v1677_v43  ;;  %vm764_vm9 = vcmp.le.f32.partialorder %v748_v38, 1.0  ;;  %v828_v52 = vmax.f32 %v812_v2, 0.0  ;;  %v640_v15 = vsel %vm638_vm15, %v639_v18, %v637_v41 }
 0x157   : > { %879 = vst.msk [vmem:[%s2031_s26] sm:$0xff] %vm878_vm4, %v748_v38  ;;  %vm664_vm11 = vcmp.eq.f32.partialorder %v2242_v16, inf  ;;  %v780_v51 = vsel %vm764_vm9, 1.0, %v1677_v43  ;;  %v751_v21 = vand.u32 2147483647, %v735_v48  ;;  %v815_v57 = vadd.f32 1.0, %v799_v11 }
 0x158   : > { %897 = vst.msk [vmem:[%s2031_s26 + $0x8] sm:$0xff] %vm895_vm8, %v781_v50  ;;  %v734_v59 = vsub.f32 %v640_v15, %v2028_v40  ;;  %v1461_v25 = vpop.eup %1460  ;;  %896 = vst.msk [vmem:[%s2031_s26] sm:$0xff] %vm895_vm8, %v780_v51  ;;  %v798_v47 = vsub.f32 %v2028_v40, %v640_v15  ;;  %v656_v61 = vmul.f32 %v1457_v35, %v2197_v58  ;;  %vm666_vm12 = vcmp.eq.f32.partialorder %v2242_v16, 0.0 }
 0x159   : > { %864 = vst.msk [vmem:[%s2031_s26 + $0x10] sm:$0xff] %vm861_vm14, %v640_v15  ;;  %v649_v34 = vmul.f32 %v1459_v45, %v2206_v60  ;;  %vm767_vm13 = vcmp.le.f32.partialorder %v751_v21, 1.0  ;;  %v831_v36 = vmax.f32 %v815_v57, 0.0  ;;  %v670_v10 = vmul.f32 %v1461_v25, %v2233_v12  ;;  %v1463_v13 = vpop.eup %1462  ;;  %v2401_v51 = vpop.xlane.xlu1 %614 }
 0x15a   : > { %914 = vst.msk [vmem:[%s2031_s26 + $0x8] sm:$0xff] %vm912_vm10, %v829_v0  ;;  %913 = vst.msk [vmem:[%s2031_s26] sm:$0xff] %vm912_vm10, %v828_v52  ;;  %v750_v40 = vand.u32 2147483647, %v734_v59  ;;  %v783_v44 = vsel %vm767_vm13, 1.0, %v1677_v43  ;;  %v814_v17 = vadd.f32 1.0, %v798_v47  ;;  %v658_v18 = vsel %vm657_vm0, %v2197_v58, %v656_v61 }
 0x15b   : > { %882 = vst.msk [vmem:[%s2031_s26 + $0x18] sm:$0xff] %vm878_vm4, %v751_v21  ;;  %v651_v20 = vsel %vm650_vm1, %v2206_v60, %v649_v34  ;;  %vm685_vm15 = vcmp.eq.f32.partialorder %v2266_v29, inf  ;;  %v661_v54 = vsel %vm659_vm2, %v660_v19, %v658_v18  ;;  %v672_v56 = vsel %vm671_vm5, %v2233_v12, %v670_v10 }
 0x15c   : > { %899 = vst.msk [vmem:[%s2031_s26 + $0x18] sm:$0xff] %vm895_vm8, %v783_v44  ;;  %vm766_vm7 = vcmp.le.f32.partialorder %v750_v40, 1.0  ;;  %v654_v22 = vsel %vm652_vm3, %v653_v23, %v651_v20  ;;  %v1465_v24 = vpop.eup %1464  ;;  %v830_v27 = vmax.f32 %v814_v17, 0.0  ;;  %v737_v58 = vsub.f32 %v661_v54, %v2071_v62 }
 0x15d   : > { %881 = vst.msk [vmem:[%s2031_s26 + $0x10] sm:$0xff] %vm878_vm4, %v750_v40  ;;  %v782_v1 = vsel %vm766_vm7, 1.0, %v1677_v43  ;;  %v801_v19 = vsub.f32 %v2071_v62, %v661_v54  ;;  %v736_v60 = vsub.f32 %v654_v22, %v2078_v3  ;;  %v800_v23 = vsub.f32 %v2078_v3, %v654_v22  ;;  %v2370_v3 = vpop.xlane.xlu0 %608 }
 0x15e   : > { %916 = vst.msk [vmem:[%s2031_s26 + $0x18] sm:$0xff] %vm912_vm10, %v831_v36  ;;  %v675_v4 = vsel %vm673_vm6, %v674_v33, %v672_v56  ;;  %v663_v30 = vmul.f32 %v1463_v13, %v2242_v16  ;;  %v753_v62 = vand.u32 2147483647, %v737_v58  ;;  %v684_v35 = vmul.f32 %v1465_v24, %v2266_v29  ;;  %v2427_v36 = vpop.xlane.xlu1 %618 }
 0x15f   : > { %867 = vst.msk [vmem:[%s2031_s26 + $0x28] sm:$0xff] %vm861_vm14, %v661_v54  ;;  %866 = vst.msk [vmem:[%s2031_s26 + $0x20] sm:$0xff] %vm861_vm14, %v654_v22  ;;  %v817_v53 = vadd.f32 1.0, %v801_v19  ;;  %v739_v32 = vsub.f32 %v675_v4, %v2097_v14  ;;  %v803_v9 = vsub.f32 %v2097_v14, %v675_v4  ;;  %v752_v12 = vand.u32 2147483647, %v736_v60 }
 0x160   : > { %898 = vst.msk [vmem:[%s2031_s26 + $0x10] sm:$0xff] %vm895_vm8, %v782_v1  ;;  %v816_v42 = vadd.f32 1.0, %v800_v23  ;;  %v665_v33 = vsel %vm664_vm11, %v2242_v16, %v663_v30  ;;  %vm769_vm0 = vcmp.le.f32.partialorder %v753_v62, 1.0  ;;  %v686_v52 = vsel %vm685_vm15, %v2266_v29, %v684_v35 }
 0x161   : > { %915 = vst.msk [vmem:[%s2031_s26 + $0x10] sm:$0xff] %vm912_vm10, %v830_v27  ;;  %v833_v38 = vmax.f32 %v817_v53, 0.0  ;;  %v755_v14 = vand.u32 2147483647, %v739_v32  ;;  %v819_v2 = vadd.f32 1.0, %v803_v9  ;;  %v785_v5 = vsel %vm769_vm0, 1.0, %v1677_v43 }
 0x162   : > { %869 = vst.msk [vmem:[%s2031_s26 + $0x38] sm:$0xff] %vm861_vm14, %v675_v4  ;;  %vm768_vm1 = vcmp.le.f32.partialorder %v752_v12, 1.0  ;;  %v832_v41 = vmax.f32 %v816_v42, 0.0  ;;  %v668_v45 = vsel %vm666_vm12, %v667_v6, %v665_v33  ;;  %v688_v15 = vand.u32 2147483648, %v2266_v29 }
 0x163   : > { %884 = vst.msk [vmem:[%s2031_s26 + $0x28] sm:$0xff] %vm878_vm4, %v753_v62  ;;  %883 = vst.msk [vmem:[%s2031_s26 + $0x20] sm:$0xff] %vm878_vm4, %v752_v12  ;;  %v784_v0 = vsel %vm768_vm1, 1.0, %v1677_v43  ;;  %vm771_vm2 = vcmp.le.f32.partialorder %v755_v14, 1.0  ;;  %v835_v48 = vmax.f32 %v819_v2, 0.0  ;;  %v738_v11 = vsub.f32 %v668_v45, %v2104_v46 }
 0x164   : > { %901 = vst.msk [vmem:[%s2031_s26 + $0x28] sm:$0xff] %vm895_vm8, %v785_v5  ;;  %900 = vst.msk [vmem:[%s2031_s26 + $0x20] sm:$0xff] %vm895_vm8, %v784_v0  ;;  %v787_v16 = vsel %vm771_vm2, 1.0, %v1677_v43  ;;  %v802_v50 = vsub.f32 %v2104_v46, %v668_v45  ;;  %vm687_vm3 = vcmp.eq.f32.partialorder %v2266_v29, 0.0  ;;  %1466 = vrsqrt.f32 %v2314_v7  ;;  %v2409_v46 = vpop.xlane.xlu0 %612 }
 0x165   : > { %886 = vst.msk [vmem:[%s2031_s26 + $0x38] sm:$0xff] %vm878_vm4, %v755_v14  ;;  %v754_v21 = vand.u32 2147483647, %v738_v11  ;;  %v689_v59 = vsel %vm687_vm3, %v688_v15, %v686_v52  ;;  %1468 = vrsqrt.f32 %v2362_v31  ;;  %vm678_vm9 = vcmp.eq.f32.partialorder %v2314_v7, inf }
 0x166   : > { %868 = vst.msk [vmem:[%s2031_s26 + $0x30] sm:$0xff] %vm861_vm14, %v668_v45  ;;  %v818_v57 = vadd.f32 1.0, %v802_v50  ;;  %v741_v25 = vsub.f32 %v689_v59, %v2123_v26  ;;  %v805_v47 = vsub.f32 %v2123_v26, %v689_v59  ;;  %871 = vst.msk [vmem:[%s2031_s26 + $0x48] sm:$0xff] %vm861_vm14, %v689_v59  ;;  %1470 = vrsqrt.f32 %v2370_v3 }
 0x167   : > { %918 = vst.msk [vmem:[%s2031_s26 + $0x28] sm:$0xff] %vm912_vm10, %v833_v38  ;;  %917 = vst.msk [vmem:[%s2031_s26 + $0x20] sm:$0xff] %vm912_vm10, %v832_v41  ;;  %vm770_vm5 = vcmp.le.f32.partialorder %v754_v21, 1.0  ;;  %1472 = vrsqrt.f32 %v2401_v51  ;;  %vm680_vm11 = vcmp.eq.f32.partialorder %v2314_v7, 0.0  ;;  %v681_v18 = vand.u32 2147483648, %v2314_v7 }
 0x168   : > { %903 = vst.msk [vmem:[%s2031_s26 + $0x38] sm:$0xff] %vm895_vm8, %v787_v16  ;;  %v786_v29 = vsel %vm770_vm5, 1.0, %v1677_v43  ;;  %v834_v61 = vmax.f32 %v818_v57, 0.0  ;;  %v757_v34 = vand.u32 2147483647, %v741_v25  ;;  %v821_v6 = vadd.f32 1.0, %v805_v47  ;;  %v2431_v40 = vpop.xlane.xlu0 %616 }
 0x169   : > { %920 = vst.msk [vmem:[%s2031_s26 + $0x38] sm:$0xff] %vm912_vm10, %v835_v48  ;;  %1474 = vrsqrt.f32 %v2409_v46  ;;  %vm699_vm12 = vcmp.eq.f32.partialorder %v2362_v31, inf  ;;  %vm701_vm13 = vcmp.eq.f32.partialorder %v2362_v31, 0.0  ;;  %v702_v54 = vand.u32 2147483648, %v2362_v31 }
 0x16a   : > { %885 = vst.msk [vmem:[%s2031_s26 + $0x30] sm:$0xff] %vm878_vm4, %v754_v21  ;;  %vm773_vm6 = vcmp.le.f32.partialorder %v757_v34, 1.0  ;;  %v837_v26 = vmax.f32 %v821_v6, 0.0  ;;  %888 = vst.msk [vmem:[%s2031_s26 + $0x48] sm:$0xff] %vm878_vm4, %v757_v34  ;;  %1476 = vrsqrt.f32 %v2427_v36  ;;  %vm692_vm15 = vcmp.eq.f32.partialorder %v2370_v3, inf }
 0x16b   : > { %902 = vst.msk [vmem:[%s2031_s26 + $0x30] sm:$0xff] %vm895_vm8, %v786_v29  ;;  %v789_v10 = vsel %vm773_vm6, 1.0, %v1677_v43  ;;  %1478 = vrsqrt.f32 %v2431_v40  ;;  %vm694_vm7 = vcmp.eq.f32.partialorder %v2370_v3, 0.0  ;;  %v695_v56 = vand.u32 2147483648, %v2370_v3 }
 0x16c   : > { %919 = vst.msk [vmem:[%s2031_s26 + $0x30] sm:$0xff] %vm912_vm10, %v834_v61  ;;  %vm713_vm0 = vcmp.eq.f32.partialorder %v2401_v51, inf  ;;  %vm715_vm1 = vcmp.eq.f32.partialorder %v2401_v51, 0.0  ;;  %v716_v58 = vand.u32 2147483648, %v2401_v51  ;;  %v709_v19 = vand.u32 2147483648, %v2409_v46 }
 0x16d   : > { %905 = vst.msk [vmem:[%s2031_s26 + $0x48] sm:$0xff] %vm895_vm8, %v789_v10  ;;  %vm706_vm2 = vcmp.eq.f32.partialorder %v2409_v46, inf  ;;  %vm727_vm3 = vcmp.eq.f32.partialorder %v2427_v36, inf  ;;  %vm708_vm5 = vcmp.eq.f32.partialorder %v2409_v46, 0.0  ;;  %vm729_vm6 = vcmp.eq.f32.partialorder %v2427_v36, 0.0 }
 0x16e   : > { %922 = vst.msk [vmem:[%s2031_s26 + $0x48] sm:$0xff] %vm912_vm10, %v837_v26  ;;  %v1467_v13 = vpop.eup %1466  ;;  %v723_v25 = vand.u32 2147483648, %v2431_v40 }
 0x16f   : > { %v1469_v44 = vpop.eup %1468  ;;  %v677_v17 = vmul.f32 %v1467_v13, %v2314_v7 }
 0x170   : > { %v698_v20 = vmul.f32 %v1469_v44, %v2362_v31  ;;  %v1471_v24 = vpop.eup %1470 }
 0x171   : > { %v679_v22 = vsel %vm678_vm9, %v2314_v7, %v677_v17  ;;  %v1473_v60 = vpop.eup %1472  ;;  %v691_v30 = vmul.f32 %v1471_v24, %v2370_v3  ;;  %vm720_vm9 = vcmp.eq.f32.partialorder %v2431_v40, inf }
 0x172   : > { %v682_v1 = vsel %vm680_vm11, %v681_v18, %v679_v22  ;;  %v700_v27 = vsel %vm699_vm12, %v2362_v31, %v698_v20  ;;  %v712_v32 = vmul.f32 %v1473_v60, %v2401_v51  ;;  %vm722_vm11 = vcmp.eq.f32.partialorder %v2431_v40, 0.0 }
 0x173   : > { %v740_v23 = vsub.f32 %v682_v1, %v2130_v28  ;;  %v804_v7 = vsub.f32 %v2130_v28, %v682_v1  ;;  %870 = vst.msk [vmem:[%s2031_s26 + $0x40] sm:$0xff] %vm861_vm14, %v682_v1  ;;  %v703_v4 = vsel %vm701_vm13, %v702_v54, %v700_v27  ;;  %v730_v28 = vand.u32 2147483648, %v2427_v36  ;;  %v1475_v31 = vpop.eup %1474 }
 0x174   : > { %v743_v62 = vsub.f32 %v703_v4, %v2150_v37  ;;  %v807_v53 = vsub.f32 %v2150_v37, %v703_v4  ;;  %873 = vst.msk [vmem:[%s2031_s26 + $0x58] sm:$0xff] %vm861_vm14, %v703_v4  ;;  %v693_v42 = vsel %vm692_vm15, %v2370_v3, %v691_v30  ;;  %v1477_v37 = vpop.eup %1476  ;;  %v714_v14 = vsel %vm713_vm0, %v2401_v51, %v712_v32 }
 0x175   : > { %v756_v9 = vand.u32 2147483647, %v740_v23  ;;  %v820_v12 = vadd.f32 1.0, %v804_v7  ;;  %v696_v38 = vsel %vm694_vm7, %v695_v56, %v693_v42  ;;  %v1479_v2 = vpop.eup %1478  ;;  %v717_v48 = vsel %vm715_vm1, %v716_v58, %v714_v14 }
 0x176   : > { %v759_v33 = vand.u32 2147483647, %v743_v62  ;;  %v823_v35 = vadd.f32 1.0, %v807_v53  ;;  %v742_v41 = vsub.f32 %v696_v38, %v2158_v39  ;;  %v806_v3 = vsub.f32 %v2158_v39, %v696_v38  ;;  %872 = vst.msk [vmem:[%s2031_s26 + $0x50] sm:$0xff] %vm861_vm14, %v696_v38  ;;  %875 = vst.msk [vmem:[%s2031_s26 + $0x68] sm:$0xff] %vm861_vm14, %v717_v48 }
 0x177   : > { %vm772_vm12 = vcmp.le.f32.partialorder %v756_v9, 1.0  ;;  %v836_v5 = vmax.f32 %v820_v12, 0.0  ;;  %887 = vst.msk [vmem:[%s2031_s26 + $0x40] sm:$0xff] %vm878_vm4, %v756_v9  ;;  %v745_v39 = vsub.f32 %v717_v48, %v2182_v49  ;;  %v809_v52 = vsub.f32 %v2182_v49, %v717_v48 }
 0x178   : > { %v788_v45 = vsel %vm772_vm12, 1.0, %v1677_v43  ;;  %vm775_vm13 = vcmp.le.f32.partialorder %v759_v33, 1.0  ;;  %v839_v0 = vmax.f32 %v823_v35, 0.0  ;;  %890 = vst.msk [vmem:[%s2031_s26 + $0x58] sm:$0xff] %vm878_vm4, %v759_v33  ;;  %v758_v16 = vand.u32 2147483647, %v742_v41 }
 0x179   : > { %904 = vst.msk [vmem:[%s2031_s26 + $0x40] sm:$0xff] %vm895_vm8, %v788_v45  ;;  %v791_v11 = vsel %vm775_vm13, 1.0, %v1677_v43  ;;  %v822_v50 = vadd.f32 1.0, %v806_v3  ;;  %v705_v15 = vmul.f32 %v1475_v31, %v2409_v46  ;;  %v726_v51 = vmul.f32 %v1477_v37, %v2427_v36 }
 0x17a   : > { %921 = vst.msk [vmem:[%s2031_s26 + $0x40] sm:$0xff] %vm912_vm10, %v836_v5  ;;  %v719_v21 = vmul.f32 %v1479_v2, %v2431_v40  ;;  %vm774_vm15 = vcmp.le.f32.partialorder %v758_v16, 1.0  ;;  %v761_v59 = vand.u32 2147483647, %v745_v39  ;;  %v825_v47 = vadd.f32 1.0, %v809_v52 }
 0x17b   : > { %907 = vst.msk [vmem:[%s2031_s26 + $0x58] sm:$0xff] %vm895_vm8, %v791_v11  ;;  %v838_v57 = vmax.f32 %v822_v50, 0.0  ;;  %v790_v49 = vsel %vm774_vm15, 1.0, %v1677_v43  ;;  %v707_v29 = vsel %vm706_vm2, %v2409_v46, %v705_v15  ;;  %v728_v61 = vsel %vm727_vm3, %v2427_v36, %v726_v51 }
 0x17c   : > { %924 = vst.msk [vmem:[%s2031_s26 + $0x58] sm:$0xff] %vm912_vm10, %v839_v0  ;;  %vm777_vm7 = vcmp.le.f32.partialorder %v761_v59, 1.0  ;;  %v710_v34 = vsel %vm708_vm5, %v709_v19, %v707_v29  ;;  %v731_v6 = vsel %vm729_vm6, %v730_v28, %v728_v61  ;;  %v721_v26 = vsel %vm720_vm9, %v2431_v40, %v719_v21 }
 0x17d   : > { %889 = vst.msk [vmem:[%s2031_s26 + $0x50] sm:$0xff] %vm878_vm4, %v758_v16  ;;  %892 = vst.msk [vmem:[%s2031_s26 + $0x68] sm:$0xff] %vm878_vm4, %v761_v59  ;;  %v793_v10 = vsel %vm777_vm7, 1.0, %v1677_v43  ;;  %v841_v13 = vmax.f32 %v825_v47, 0.0  ;;  %v744_v44 = vsub.f32 %v710_v34, %v2192_v55  ;;  %v808_v17 = vsub.f32 %v2192_v55, %v710_v34 }
 0x17e   : > { %906 = vst.msk [vmem:[%s2031_s26 + $0x50] sm:$0xff] %vm895_vm8, %v790_v49  ;;  %909 = vst.msk [vmem:[%s2031_s26 + $0x68] sm:$0xff] %vm895_vm8, %v793_v10  ;;  %v747_v46 = vsub.f32 %v731_v6, %v2216_v63  ;;  %v811_v36 = vsub.f32 %v2216_v63, %v731_v6  ;;  %v724_v18 = vsel %vm722_vm11, %v723_v25, %v721_v26 }
 0x17f   : > { %923 = vst.msk [vmem:[%s2031_s26 + $0x50] sm:$0xff] %vm912_vm10, %v838_v57  ;;  %926 = vst.msk [vmem:[%s2031_s26 + $0x68] sm:$0xff] %vm912_vm10, %v841_v13  ;;  %v760_v20 = vand.u32 2147483647, %v744_v44  ;;  %v824_v55 = vadd.f32 1.0, %v808_v17  ;;  %v746_v54 = vsub.f32 %v724_v18, %v2228_v8  ;;  %v810_v22 = vsub.f32 %v2228_v8, %v724_v18 }
 0x180   : > { %874 = vst.msk [vmem:[%s2031_s26 + $0x60] sm:$0xff] %vm861_vm14, %v710_v34  ;;  %877 = vst.msk [vmem:[%s2031_s26 + $0x78] sm:$0xff] %vm861_vm14, %v731_v6  ;;  %v763_v56 = vand.u32 2147483647, %v747_v46  ;;  %v827_v24 = vadd.f32 1.0, %v811_v36 }
 0x181   : > { %876 = vst.msk [vmem:[%s2031_s26 + $0x70] sm:$0xff] %vm861_vm14, %v724_v18  ;;  %vm776_vm0 = vcmp.le.f32.partialorder %v760_v20, 1.0  ;;  %v840_v63 = vmax.f32 %v824_v55, 0.0  ;;  %v762_v40 = vand.u32 2147483647, %v746_v54  ;;  %v826_v1 = vadd.f32 1.0, %v810_v22 }
 0x182   : > { %891 = vst.msk [vmem:[%s2031_s26 + $0x60] sm:$0xff] %vm878_vm4, %v760_v20  ;;  %v792_v27 = vsel %vm776_vm0, 1.0, %v1677_v43  ;;  %vm779_vm1 = vcmp.le.f32.partialorder %v763_v56, 1.0  ;;  %v843_v8 = vmax.f32 %v827_v24, 0.0  ;;  %894 = vst.msk [vmem:[%s2031_s26 + $0x78] sm:$0xff] %vm878_vm4, %v763_v56  ;;  %935 = sbr.rel (!%p2687_p7) target bundleno = 442 (0x1ba), region = 48 }
 0x183   : > { %908 = vst.msk [vmem:[%s2031_s26 + $0x60] sm:$0xff] %vm895_vm8, %v792_v27  ;;  %v795_v58 = vsel %vm779_vm1, 1.0, %v1677_v43  ;;  %vm778_vm14 = vcmp.le.f32.partialorder %v762_v40, 1.0  ;;  %v842_v19 = vmax.f32 %v826_v1, 0.0 }
 0x184   : > { %893 = vst.msk [vmem:[%s2031_s26 + $0x70] sm:$0xff] %vm878_vm4, %v762_v40  ;;  %v794_v60 = vsel %vm778_vm14, 1.0, %v1677_v43 }
 0x185   : > { %925 = vst.msk [vmem:[%s2031_s26 + $0x60] sm:$0xff] %vm912_vm10, %v840_v63 }
 0x186   : > { %911 = vst.msk [vmem:[%s2031_s26 + $0x78] sm:$0xff] %vm895_vm8, %v795_v58  ;;  %910 = vst.msk [vmem:[%s2031_s26 + $0x70] sm:$0xff] %vm895_vm8, %v794_v60 }
 0x187   : > { %928 = vst.msk [vmem:[%s2031_s26 + $0x78] sm:$0xff] %vm912_vm10, %v843_v8  ;;  %927 = vst.msk [vmem:[%s2031_s26 + $0x70] sm:$0xff] %vm912_vm10, %v842_v19 }
 0x189   : > { %s2702_s19 = smov (!%p938_p4, %s937_s19), 16 }
 0x18a   : > { %s1289_s9 = sshll.u32 %s2702_s19, 7 }
 0x18b   : > { %p1292_p5 = scmp.eq.s32.totalorder %s1289_s9, 0 }
 0x18c   : > { %s2590_s23 = sshrl.u32 (!%p1292_p5), %s2702_s19, 4 }
 0x18d   : > { %946 = sbr.rel (%p1292_p5) target bundleno = 442 (0x1ba), region = 52  ;;  %p1293_p9 = scmp.le.s32.totalorder (!%p1292_p5), %s2590_s23, 0 }
 0x194   : > { %1193 = sbr.rel (%p1293_p9) target bundleno = 421 (0x1a5), region = 150  ;;  %s2688_s16 = smov (!%p1293_p9), %s2584_s8 }
 0x195   : > { %s2689_s27 = smov (!%p1293_p9), %s2031_s26  ;;  %s2599_s29 = smov (!%p1293_p9), 0  }
 0x196   : > { %s2601_s4 = smov (!%p1293_p9), 0  }
 0x19b LB: >> { %v1038_v43 = vld [vmem:[%s1642_s27] sm:$0xff]  ;;  %v1040_v23 = vld [vmem:[%s1642_s27 + $0x8] sm:$0xff]  ;;  %v1042_v7 = vld [vmem:[%s1642_s27 + $0x10] sm:$0xff]  ;;  %s1070_s6 = sadd.s32 1, %s1646_s29  ;;  %s1032_s4 = sadd.s32 1, %s1650_s4   ;;  %s1650_s4 = sphi %s2601_s4, %s1032_s4   ;;  %s1646_s29 = sphi %s2599_s29, %s2690_s29   ;;  %s1642_s27 = sphi %s2689_s27, %s1075_s27   ;;  %s1638_s16 = sphi %s2688_s16, %s1076_s16  }
 0x19c   : >> { %1039 = vst [vmem:[%s1638_s16] sm:$0xff] %v1038_v43  ;;  %1041 = vst [vmem:[%s1638_s16 + $0x8] sm:$0xff] %v1040_v23  ;;  %v1044_v4 = vld [vmem:[%s1642_s27 + $0x18] sm:$0xff]  ;;  %v1046_v30 = vld [vmem:[%s1642_s27 + $0x20] sm:$0xff]  ;;  %p1071_p10 = scmp.ge.s32.totalorder %s1070_s6, %s2590_s23  ;;  %p1031_p12 = scmp.ge.s32.totalorder %s1032_s4, %s2590_s23 }
 0x19d   : >> { %1043 = vst [vmem:[%s1638_s16 + $0x10] sm:$0xff] %v1042_v7  ;;  %v1048_v62 = vld [vmem:[%s1642_s27 + $0x28] sm:$0xff]  ;;  %1045 = vst [vmem:[%s1638_s16 + $0x18] sm:$0xff] %v1044_v4  ;;  %v1050_v53 = vld [vmem:[%s1642_s27 + $0x30] sm:$0xff] }
 0x19e   : >> { %1047 = vst [vmem:[%s1638_s16 + $0x20] sm:$0xff] %v1046_v30  ;;  %1049 = vst [vmem:[%s1638_s16 + $0x28] sm:$0xff] %v1048_v62  ;;  %v1052_v32 = vld [vmem:[%s1642_s27 + $0x38] sm:$0xff]  ;;  %v1054_v28 = vld [vmem:[%s1642_s27 + $0x40] sm:$0xff]  ;;  %s2704_s6 = smov (%p1071_p10, %s1070_s6), 0  ;;  %1034 = sbr.rel (!%p1031_p12) target bundleno = 411 (0x19b), region = 156 }
 0x19f   : >> { %1051 = vst [vmem:[%s1638_s16 + $0x30] sm:$0xff] %v1050_v53  ;;  %1053 = vst [vmem:[%s1638_s16 + $0x38] sm:$0xff] %v1052_v32  ;;  %v1056_v31 = vld [vmem:[%s1642_s27 + $0x48] sm:$0xff]  ;;  %v1058_v9 = vld [vmem:[%s1642_s27 + $0x50] sm:$0xff]  ;;  %s1294_s18 = sshll.u32 %s2704_s6, 7  ;;  %s2690_s29 = smov %s2704_s6 }
 0x1a0   : >> { %1055 = vst [vmem:[%s1638_s16 + $0x40] sm:$0xff] %v1054_v28  ;;  %v1060_v12 = vld [vmem:[%s1642_s27 + $0x58] sm:$0xff]  ;;  %1057 = vst [vmem:[%s1638_s16 + $0x48] sm:$0xff] %v1056_v31  ;;  %v1062_v42 = vld [vmem:[%s1642_s27 + $0x60] sm:$0xff] }
 0x1a1   : >> { %1059 = vst [vmem:[%s1638_s16 + $0x50] sm:$0xff] %v1058_v9  ;;  %1061 = vst [vmem:[%s1638_s16 + $0x58] sm:$0xff] %v1060_v12  ;;  %v1064_v37 = vld [vmem:[%s1642_s27 + $0x68] sm:$0xff]  ;;  %v1066_v33 = vld [vmem:[%s1642_s27 + $0x70] sm:$0xff] }
 0x1a2   : >> { %1063 = vst [vmem:[%s1638_s16 + $0x60] sm:$0xff] %v1062_v42  ;;  %1065 = vst [vmem:[%s1638_s16 + $0x68] sm:$0xff] %v1064_v37  ;;  %v1068_v35 = vld [vmem:[%s1642_s27 + $0x78] sm:$0xff]  ;;  %s1075_s27 = scalar_lea.vmem %s2031_s26, %s1294_s18 [#allocation7]  }
 0x1a3   : >> { %1067 = vst [vmem:[%s1638_s16 + $0x70] sm:$0xff] %v1066_v33  ;;  %1069 = vst [vmem:[%s1638_s16 + $0x78] sm:$0xff] %v1068_v35  ;;  %s1076_s16 = scalar_lea.vmem %s2584_s8, %s1294_s18  }
 0x1a5 PF: > { %s2659_s21 = sand.u32 15, %s2702_s19   ;;  %s1308_s24 = sshll.u32 %s2590_s23, 7 }
 0x1a6   : > { %s1081_s25 = scalar_lea.vmem %s2031_s26, %s1308_s24 [#allocation7]   ;;  %s1083_s11 = scalar_lea.vmem %s2584_s8, %s1308_s24  }
 0x1a7   : > { %p1299_p6 = scmp.le.s32.totalorder %s2659_s21, 0 }
 0x1a8   : > { %s1652_s15 = smov (!%p1299_p6), %s1083_s11   ;;  %s1656_s5 = smov (!%p1299_p6), %s1081_s25  }
 0x1a9   : > { %1207 = sbr.rel (%p1299_p6) target bundleno = 442 (0x1ba), region = 161  ;;  %s1660_s7 = smov (!%p1299_p6), 0  }
 0x1aa   : > { %s1664_s22 = smov (!%p1299_p6), 0  }
 0x1b0 LB: >> { %v1093_v38 = vld [vmem:[%s1658_s5] sm:$0xff]  ;;  %s1095_s10 = sadd.s32 1, %s1662_s7  ;;  %s1087_s22 = sadd.s32 1, %s1666_s22   ;;  %s1666_s22 = sphi %s1664_s22, %s1087_s22   ;;  %s1662_s7 = sphi %s1660_s7, %s1661_s7   ;;  %s1658_s5 = sphi %s1656_s5, %s1100_s5   ;;  %s1654_s15 = sphi %s1652_s15, %s1101_s15  }
 0x1b1   : >> { %1094 = vst [vmem:[%s1654_s15] sm:$0xff] %v1093_v38  ;;  %p1096_p11 = scmp.ge.s32.totalorder %s1095_s10, %s2659_s21  ;;  %p1086_p13 = scmp.ge.s32.totalorder %s1087_s22, %s2659_s21 }
 0x1b3   : >> { %s2706_s10 = smov (%p1096_p11, %s1095_s10), 0  ;;  %1089 = sbr.rel (!%p1086_p13) target bundleno = 432 (0x1b0), region = 167 }
 0x1b4   : >> { %s1300_s26 = sshll.u32 %s2706_s10, 3  ;;  %s1661_s7 = smov %s2706_s10  }
 0x1b5   : >> { %s1100_s5 = scalar_lea.vmem %s1081_s25, %s1300_s26 [#allocation7]   ;;  %s1101_s15 = scalar_lea.vmem %s1083_s11, %s1300_s26  }
 0x1ba PF: > { %p16_p2 = scmp.ge.s32.totalorder %s1720_s17, 5   ;;  %s2691_s12 = smov %s1626_s13 }
 0x1bb   : > { %s2692_s13 = smov %s1630_s14  ;;  %s2693_s14 = smov %s1730_s20 }
 0x1bc   : > { %s2694_s15 = smov %s1720_s17  ;;  %18 = sbr.rel (!%p16_p2) target bundleno = 5 (0x5), region = 178 }
 0x1c3   :  { %1117 = vsyncpa [#allocation3], 1 }
 0x1c4   :  { %1119 = vsyncpa [#allocation3 + $0x1], 1 }
 0x1c5   :  { %1120 = vsyncpa [#allocation5], 1 }
 0x1c6   :  { %1122 = vsyncpa [#allocation5 + $0x1], 1 }

</bundles_post_ra>
